<compile_context>
chip_gen: v6e
topology: v6e:2x2x1
jax: 0.10.0
libtpu: 0.0.40
codegen_flags: <defaults>
</compile_context>

<pallas_src>
import functools

import jax
import jax.numpy as jnp
import numpy as np
from jax import lax
from jax.experimental import pallas as pl
from jax.experimental.pallas import tpu as pltpu


def spatial_attn_kernel(w_ref, m_ref, x_ref, o_ref, pf_ref, *, H, W, K, PAD):
    # w_ref : SMEM f32[2*K*K]        conv weight, index = c*K*K + ky*K + kx
    # m_ref : VMEM f32[K, PF]        per-kx column-validity masks over padded flat positions
    # x_ref : VMEM f32[Bt, C, H*W]   one batch block, spatial flattened (lane-dense)
    # o_ref : VMEM f32[Bt, H*W]
    # pf_ref: VMEM f32[2, Bt, PF]    zero-padded flattened pooled planes (scratch)
    HW = H * W
    MAXOFF = PAD * W + PAD          # flat offset covered by the zero padding on each side
    PF = HW + 2 * MAXOFF
    Bt = x_ref.shape[0]

    # Channel mean / max reduction — lane-dense, compiler tree-reduction over C.
    x = x_ref[...].astype(jnp.float32)          # (Bt, C, HW)
    mean = jnp.mean(x, axis=1)                  # (Bt, HW)
    mx = jnp.max(x, axis=1)                     # (Bt, HW)

    # Refresh only the two pad strips (cheap); the interior is overwritten below.
    if MAXOFF:
        zstrip = jnp.zeros((2, Bt, MAXOFF), jnp.float32)
        pf_ref[:, :, :MAXOFF] = zstrip
        pf_ref[:, :, MAXOFF + HW:PF] = zstrip
    pf_ref[0, :, MAXOFF:MAXOFF + HW] = mean
    pf_ref[1, :, MAXOFF:MAXOFF + HW] = mx

    # Hoist the padded planes into registers once (a few vregs each).
    planes = (pf_ref[0, :, :], pf_ref[1, :, :])     # 2 x (Bt, PF)

    # 4 independent accumulator chains: 2 pooled channels x (even/odd ky).
    accs = [jnp.zeros((Bt, HW), jnp.float32) for _ in range(4)]
    for kx in range(K):
        mask = m_ref[kx:kx + 1, :]                  # (1, PF) column validity for this kx
        srcs = (planes[0] * mask, planes[1] * mask)
        for ky in range(K):
            off = ky * W + kx                       # static lane offset of this tap
            for c in range(2):
                wv = w_ref[c * K * K + ky * K + kx]
                a = 2 * c + (ky & 1)
                accs[a] = accs[a] + wv * srcs[c][:, off:off + HW]

    y = (accs[0] + accs[1]) + (accs[2] + accs[3])
    o_ref[...] = jax.nn.sigmoid(y).astype(o_ref.dtype)


def _pick_batch_block(B, max_bt=8):
    if B <= max_bt:
        return B
    for d in range(max_bt, 0, -1):
        if B % d == 0 and d % 8 == 0:   # keep the output block (Bt, HW) tile-legal
            return d
    return B                            # fall back: whole batch in one grid step


def spatial_attn(x, weight, kernel_size=7, max_block_b=8):
    """x: f32[B, C, H, W] (NCHW); weight: f32[1, 2, k, k] (OIHW, no bias)."""
    B, C, H, W = x.shape
    K = kernel_size
    PAD = (K - 1) // 2
    HW = H * W
    MAXOFF = PAD * W + PAD
    PF = HW + 2 * MAXOFF

    Bt = _pick_batch_block(B, max_block_b)
    grid = (B // Bt,)

    # Lane-dense input / output layout: flatten spatial dims to H*W.
    xf = x.reshape(B, C, HW)
    w_flat = weight.reshape(-1).astype(jnp.float32)          # (2*K*K,)

    # Static per-kx column-validity masks over padded flat positions.
    col = (np.arange(PF) - MAXOFF) % W
    masks_np = np.zeros((K, PF), np.float32)
    for kx in range(K):
        d = kx - PAD
        lo, hi = max(d, 0), W + min(d, 0)
        masks_np[kx] = ((col >= lo) & (col < hi)).astype(np.float32)
    masks = jnp.asarray(masks_np)

    kernel = functools.partial(spatial_attn_kernel, H=H, W=W, K=K, PAD=PAD)

    out = pl.pallas_call(
        kernel,
        out_shape=jax.ShapeDtypeStruct((B, HW), x.dtype),
        grid_spec=pltpu.PrefetchScalarGridSpec(
            num_scalar_prefetch=0,
            grid=grid,
            in_specs=[
                pl.BlockSpec(memory_space=pltpu.SMEM),             # conv weights (scalars)
                pl.BlockSpec((K, PF), lambda b: (0, 0)),           # column masks (constant block)
                pl.BlockSpec((Bt, C, HW), lambda b: (b, 0, 0)),    # batch block of images
            ],
            out_specs=pl.BlockSpec((Bt, HW), lambda b: (b, 0)),
            scratch_shapes=[pltpu.VMEM((2, Bt, PF), jnp.float32)],
        ),
        compiler_params=pltpu.CompilerParams(
            dimension_semantics=("parallel",),                     # batch steps are independent
        ),
    )(w_flat, masks, xf)
    return out.reshape(B, 1, H, W)


def spatial_attn_ref(x, weight):
    """Plain-JAX reference (mirrors the PyTorch forward) for correctness check."""
    x1 = jnp.mean(x, axis=1, keepdims=True)
    x2 = jnp.max(x, axis=1, keepdims=True)
    xc = jnp.concatenate([x1, x2], axis=1)  # (B, 2, H, W)
    y = lax.conv_general_dilated(
        xc, weight,
        window_strides=(1, 1),
        padding=((3, 3), (3, 3)),
        dimension_numbers=("NCHW", "OIHW", "NCHW"),
    )
    return jax.nn.sigmoid(y)


if __name__ == "__main__":
    key = jax.random.PRNGKey(0)
    kx_, kw_ = jax.random.split(key)

    B, C, H, W = 2, 4, 16, 16
    x = jax.random.normal(kx_, (B, C, H, W), dtype=jnp.float32)
    # Deterministic synthetic conv weight, shape (out=1, in=2, 7, 7), no bias.
    weight = jax.random.normal(kw_, (1, 2, 7, 7), dtype=jnp.float32) * 0.1

    out = jax.block_until_ready(spatial_attn(x, weight))
    ref = jax.block_until_ready(spatial_attn_ref(x, weight))
    np.testing.assert_allclose(np.asarray(out), np.asarray(ref), rtol=1e-5, atol=1e-5)

    print("KERNEL_OK")
</pallas_src>

<mosaic_0001>
module attributes {stable_mosaic.version = 11 : i64} {
  func.func @spatial_attn_kernel(%arg0: i32, %arg1: memref<98xf32, #tpu.memory_space<smem>>, %arg2: memref<7x358xf32, #tpu.memory_space<vmem>>, %arg3: memref<2x4x256xf32, #tpu.memory_space<vmem>>, %arg4: memref<2x256xf32, #tpu.memory_space<vmem>>, %arg5: memref<2x2x358xf32, #tpu.memory_space<vmem>>) attributes {dimension_semantics = [#tpu.dimension_semantics<parallel>], iteration_bounds = array<i64: 1>, scalar_prefetch = 0 : i64, scratch_operands = 1 : i64, tpu.core_type = #tpu.core_type<tc>, window_params = [{transform_indices = @transform_0, window_bounds = array<i64: 98>}, {pipeline_mode = #tpu.pipeline_mode<synchronous>, transform_indices = @transform_1, window_bounds = array<i64: 7, 358>}, {transform_indices = @transform_2, window_bounds = array<i64: 2, 4, 256>}, {transform_indices = @transform_3, window_bounds = array<i64: 2, 256>}]} {
    %c0 = arith.constant 0 : index
    %c0_0 = arith.constant 0 : index
    %c0_1 = arith.constant 0 : index
    %0 = vector.load %arg3[%c0, %c0_0, %c0_1] : memref<2x4x256xf32, #tpu.memory_space<vmem>>, vector<2x4x256xf32>
    %cst = arith.constant dense<0.000000e+00> : vector<2x256xf32>
    %1 = vector.multi_reduction <add>, %0, %cst [1] : vector<2x4x256xf32> to vector<2x256xf32>
    %cst_2 = arith.constant 4.000000e+00 : f32
    %2 = vector.broadcast %cst_2 : f32 to vector<2x256xf32>
    %3 = arith.divf %1, %2 : vector<2x256xf32>
    %cst_3 = arith.constant dense<0xFF800000> : vector<2x256xf32>
    %4 = vector.multi_reduction <maximumf>, %0, %cst_3 [1] : vector<2x4x256xf32> to vector<2x256xf32>
    %cst_4 = arith.constant 0.000000e+00 : f32
    %5 = vector.broadcast %cst_4 : f32 to vector<2x2x51xf32>
    %c0_5 = arith.constant 0 : index
    %c0_6 = arith.constant 0 : index
    %c0_7 = arith.constant 0 : index
    %6 = vector.load %arg5[%c0_5, %c0_6, %c0_7] : memref<2x2x358xf32, #tpu.memory_space<vmem>>, vector<2x2x51xf32>
    tpu.vector_store %arg5[%c0_5, %c0_6, %c0_7], %5 {strides = array<i32>} : memref<2x2x358xf32, #tpu.memory_space<vmem>>, vector<2x2x51xf32>,
    %c0_8 = arith.constant 0 : index
    %c0_9 = arith.constant 0 : index
    %c307 = arith.constant 307 : index
    %7 = vector.load %arg5[%c0_8, %c0_9, %c307] : memref<2x2x358xf32, #tpu.memory_space<vmem>>, vector<2x2x51xf32>
    tpu.vector_store %arg5[%c0_8, %c0_9, %c307], %5 {strides = array<i32>} : memref<2x2x358xf32, #tpu.memory_space<vmem>>, vector<2x2x51xf32>,
    %c0_10 = arith.constant 0 : index
    %c0_11 = arith.constant 0 : index
    %c51 = arith.constant 51 : index
    %8 = vector.load %arg5[%c0_10, %c0_11, %c51] : memref<2x2x358xf32, #tpu.memory_space<vmem>>, vector<1x2x256xf32>
    %9 = vector.shape_cast %8 : vector<1x2x256xf32> to vector<2x256xf32>
    %10 = vector.shape_cast %3 : vector<2x256xf32> to vector<1x2x256xf32>
    tpu.vector_store %arg5[%c0_10, %c0_11, %c51], %10 {strides = array<i32>} : memref<2x2x358xf32, #tpu.memory_space<vmem>>, vector<1x2x256xf32>,
    %c1 = arith.constant 1 : index
    %c0_12 = arith.constant 0 : index
    %c51_13 = arith.constant 51 : index
    %11 = vector.load %arg5[%c1, %c0_12, %c51_13] : memref<2x2x358xf32, #tpu.memory_space<vmem>>, vector<1x2x256xf32>
    %12 = vector.shape_cast %11 : vector<1x2x256xf32> to vector<2x256xf32>
    %13 = vector.shape_cast %4 : vector<2x256xf32> to vector<1x2x256xf32>
    tpu.vector_store %arg5[%c1, %c0_12, %c51_13], %13 {strides = array<i32>} : memref<2x2x358xf32, #tpu.memory_space<vmem>>, vector<1x2x256xf32>,
    %c0_14 = arith.constant 0 : index
    %c0_15 = arith.constant 0 : index
    %c0_16 = arith.constant 0 : index
    %14 = vector.load %arg5[%c0_14, %c0_15, %c0_16] : memref<2x2x358xf32, #tpu.memory_space<vmem>>, vector<1x2x358xf32>
    %15 = vector.shape_cast %14 : vector<1x2x358xf32> to vector<2x358xf32>
    %c1_17 = arith.constant 1 : index
    %c0_18 = arith.constant 0 : index
    %c0_19 = arith.constant 0 : index
    %16 = vector.load %arg5[%c1_17, %c0_18, %c0_19] : memref<2x2x358xf32, #tpu.memory_space<vmem>>, vector<1x2x358xf32>
    %17 = vector.shape_cast %16 : vector<1x2x358xf32> to vector<2x358xf32>
    %cst_20 = arith.constant 0.000000e+00 : f32
    %18 = vector.broadcast %cst_20 : f32 to vector<2x256xf32>
    %cst_21 = arith.constant 0.000000e+00 : f32
    %19 = vector.broadcast %cst_21 : f32 to vector<2x256xf32>
    %cst_22 = arith.constant 0.000000e+00 : f32
    %20 = vector.broadcast %cst_22 : f32 to vector<2x256xf32>
    %cst_23 = arith.constant 0.000000e+00 : f32
    %21 = vector.broadcast %cst_23 : f32 to vector<2x256xf32>
    %c0_24 = arith.constant 0 : index
    %c0_25 = arith.constant 0 : index
    %22 = vector.load %arg2[%c0_24, %c0_25] : memref<7x358xf32, #tpu.memory_space<vmem>>, vector<1x358xf32>
    %23 = vector.broadcast %22 : vector<1x358xf32> to vector<2x358xf32>
    %24 = arith.mulf %15, %23 : vector<2x358xf32>
    %25 = vector.broadcast %22 : vector<1x358xf32> to vector<2x358xf32>
    %26 = arith.mulf %17, %25 : vector<2x358xf32>
    %c0_26 = arith.constant 0 : index
    %27 = memref.load %arg1[%c0_26] : memref<98xf32, #tpu.memory_space<smem>>
    %28 = vector.extract_strided_slice %24 {offsets = [0, 0], sizes = [2, 256], strides = [1, 1]} : vector<2x358xf32> to vector<2x256xf32>
    %29 = vector.broadcast %27 : f32 to vector<2x256xf32>
    %30 = arith.mulf %29, %28 : vector<2x256xf32>
    %31 = arith.addf %18, %30 : vector<2x256xf32>
    %c49 = arith.constant 49 : index
    %32 = memref.load %arg1[%c49] : memref<98xf32, #tpu.memory_space<smem>>
    %33 = vector.extract_strided_slice %26 {offsets = [0, 0], sizes = [2, 256], strides = [1, 1]} : vector<2x358xf32> to vector<2x256xf32>
    %34 = vector.broadcast %32 : f32 to vector<2x256xf32>
    %35 = arith.mulf %34, %33 : vector<2x256xf32>
    %36 = arith.addf %20, %35 : vector<2x256xf32>
    %c7 = arith.constant 7 : index
    %37 = memref.load %arg1[%c7] : memref<98xf32, #tpu.memory_space<smem>>
    %38 = vector.extract_strided_slice %24 {offsets = [0, 16], sizes = [2, 256], strides = [1, 1]} : vector<2x358xf32> to vector<2x256xf32>
    %39 = vector.broadcast %37 : f32 to vector<2x256xf32>
    %40 = arith.mulf %39, %38 : vector<2x256xf32>
    %41 = arith.addf %19, %40 : vector<2x256xf32>
    %c56 = arith.constant 56 : index
    %42 = memref.load %arg1[%c56] : memref<98xf32, #tpu.memory_space<smem>>
    %43 = vector.extract_strided_slice %26 {offsets = [0, 16], sizes = [2, 256], strides = [1, 1]} : vector<2x358xf32> to vector<2x256xf32>
    %44 = vector.broadcast %42 : f32 to vector<2x256xf32>
    %45 = arith.mulf %44, %43 : vector<2x256xf32>
    %46 = arith.addf %21, %45 : vector<2x256xf32>
    %c14 = arith.constant 14 : index
    %47 = memref.load %arg1[%c14] : memref<98xf32, #tpu.memory_space<smem>>
    %48 = vector.extract_strided_slice %24 {offsets = [0, 32], sizes = [2, 256], strides = [1, 1]} : vector<2x358xf32> to vector<2x256xf32>
    %49 = vector.broadcast %47 : f32 to vector<2x256xf32>
    %50 = arith.mulf %49, %48 : vector<2x256xf32>
    %51 = arith.addf %31, %50 : vector<2x256xf32>
    %c63 = arith.constant 63 : index
    %52 = memref.load %arg1[%c63] : memref<98xf32, #tpu.memory_space<smem>>
    %53 = vector.extract_strided_slice %26 {offsets = [0, 32], sizes = [2, 256], strides = [1, 1]} : vector<2x358xf32> to vector<2x256xf32>
    %54 = vector.broadcast %52 : f32 to vector<2x256xf32>
    %55 = arith.mulf %54, %53 : vector<2x256xf32>
    %56 = arith.addf %36, %55 : vector<2x256xf32>
    %c21 = arith.constant 21 : index
    %57 = memref.load %arg1[%c21] : memref<98xf32, #tpu.memory_space<smem>>
    %58 = vector.extract_strided_slice %24 {offsets = [0, 48], sizes = [2, 256], strides = [1, 1]} : vector<2x358xf32> to vector<2x256xf32>
    %59 = vector.broadcast %57 : f32 to vector<2x256xf32>
    %60 = arith.mulf %59, %58 : vector<2x256xf32>
    %61 = arith.addf %41, %60 : vector<2x256xf32>
    %c70 = arith.constant 70 : index
    %62 = memref.load %arg1[%c70] : memref<98xf32, #tpu.memory_space<smem>>
    %63 = vector.extract_strided_slice %26 {offsets = [0, 48], sizes = [2, 256], strides = [1, 1]} : vector<2x358xf32> to vector<2x256xf32>
    %64 = vector.broadcast %62 : f32 to vector<2x256xf32>
    %65 = arith.mulf %64, %63 : vector<2x256xf32>
    %66 = arith.addf %46, %65 : vector<2x256xf32>
    %c28 = arith.constant 28 : index
    %67 = memref.load %arg1[%c28] : memref<98xf32, #tpu.memory_space<smem>>
    %68 = vector.extract_strided_slice %24 {offsets = [0, 64], sizes = [2, 256], strides = [1, 1]} : vector<2x358xf32> to vector<2x256xf32>
    %69 = vector.broadcast %67 : f32 to vector<2x256xf32>
    %70 = arith.mulf %69, %68 : vector<2x256xf32>
    %71 = arith.addf %51, %70 : vector<2x256xf32>
    %c77 = arith.constant 77 : index
    %72 = memref.load %arg1[%c77] : memref<98xf32, #tpu.memory_space<smem>>
    %73 = vector.extract_strided_slice %26 {offsets = [0, 64], sizes = [2, 256], strides = [1, 1]} : vector<2x358xf32> to vector<2x256xf32>
    %74 = vector.broadcast %72 : f32 to vector<2x256xf32>
    %75 = arith.mulf %74, %73 : vector<2x256xf32>
    %76 = arith.addf %56, %75 : vector<2x256xf32>
    %c35 = arith.constant 35 : index
    %77 = memref.load %arg1[%c35] : memref<98xf32, #tpu.memory_space<smem>>
    %78 = vector.extract_strided_slice %24 {offsets = [0, 80], sizes = [2, 256], strides = [1, 1]} : vector<2x358xf32> to vector<2x256xf32>
    %79 = vector.broadcast %77 : f32 to vector<2x256xf32>
    %80 = arith.mulf %79, %78 : vector<2x256xf32>
    %81 = arith.addf %61, %80 : vector<2x256xf32>
    %c84 = arith.constant 84 : index
    %82 = memref.load %arg1[%c84] : memref<98xf32, #tpu.memory_space<smem>>
    %83 = vector.extract_strided_slice %26 {offsets = [0, 80], sizes = [2, 256], strides = [1, 1]} : vector<2x358xf32> to vector<2x256xf32>
    %84 = vector.broadcast %82 : f32 to vector<2x256xf32>
    %85 = arith.mulf %84, %83 : vector<2x256xf32>
    %86 = arith.addf %66, %85 : vector<2x256xf32>
    %c42 = arith.constant 42 : index
    %87 = memref.load %arg1[%c42] : memref<98xf32, #tpu.memory_space<smem>>
    %88 = vector.extract_strided_slice %24 {offsets = [0, 96], sizes = [2, 256], strides = [1, 1]} : vector<2x358xf32> to vector<2x256xf32>
    %89 = vector.broadcast %87 : f32 to vector<2x256xf32>
    %90 = arith.mulf %89, %88 : vector<2x256xf32>
    %91 = arith.addf %71, %90 : vector<2x256xf32>
    %c91 = arith.constant 91 : index
    %92 = memref.load %arg1[%c91] : memref<98xf32, #tpu.memory_space<smem>>
    %93 = vector.extract_strided_slice %26 {offsets = [0, 96], sizes = [2, 256], strides = [1, 1]} : vector<2x358xf32> to vector<2x256xf32>
    %94 = vector.broadcast %92 : f32 to vector<2x256xf32>
    %95 = arith.mulf %94, %93 : vector<2x256xf32>
    %96 = arith.addf %76, %95 : vector<2x256xf32>
    %c1_27 = arith.constant 1 : index
    %c0_28 = arith.constant 0 : index
    %97 = vector.load %arg2[%c1_27, %c0_28] : memref<7x358xf32, #tpu.memory_space<vmem>>, vector<1x358xf32>
    %98 = vector.broadcast %97 : vector<1x358xf32> to vector<2x358xf32>
    %99 = arith.mulf %15, %98 : vector<2x358xf32>
    %100 = vector.broadcast %97 : vector<1x358xf32> to vector<2x358xf32>
    %101 = arith.mulf %17, %100 : vector<2x358xf32>
    %c1_29 = arith.constant 1 : index
    %102 = memref.load %arg1[%c1_29] : memref<98xf32, #tpu.memory_space<smem>>
    %103 = vector.extract_strided_slice %99 {offsets = [0, 1], sizes = [2, 256], strides = [1, 1]} : vector<2x358xf32> to vector<2x256xf32>
    %104 = vector.broadcast %102 : f32 to vector<2x256xf32>
    %105 = arith.mulf %104, %103 : vector<2x256xf32>
    %106 = arith.addf %91, %105 : vector<2x256xf32>
    %c50 = arith.constant 50 : index
    %107 = memref.load %arg1[%c50] : memref<98xf32, #tpu.memory_space<smem>>
    %108 = vector.extract_strided_slice %101 {offsets = [0, 1], sizes = [2, 256], strides = [1, 1]} : vector<2x358xf32> to vector<2x256xf32>
    %109 = vector.broadcast %107 : f32 to vector<2x256xf32>
    %110 = arith.mulf %109, %108 : vector<2x256xf32>
    %111 = arith.addf %96, %110 : vector<2x256xf32>
    %c8 = arith.constant 8 : index
    %112 = memref.load %arg1[%c8] : memref<98xf32, #tpu.memory_space<smem>>
    %113 = vector.extract_strided_slice %99 {offsets = [0, 17], sizes = [2, 256], strides = [1, 1]} : vector<2x358xf32> to vector<2x256xf32>
    %114 = vector.broadcast %112 : f32 to vector<2x256xf32>
    %115 = arith.mulf %114, %113 : vector<2x256xf32>
    %116 = arith.addf %81, %115 : vector<2x256xf32>
    %c57 = arith.constant 57 : index
    %117 = memref.load %arg1[%c57] : memref<98xf32, #tpu.memory_space<smem>>
    %118 = vector.extract_strided_slice %101 {offsets = [0, 17], sizes = [2, 256], strides = [1, 1]} : vector<2x358xf32> to vector<2x256xf32>
    %119 = vector.broadcast %117 : f32 to vector<2x256xf32>
    %120 = arith.mulf %119, %118 : vector<2x256xf32>
    %121 = arith.addf %86, %120 : vector<2x256xf32>
    %c15 = arith.constant 15 : index
    %122 = memref.load %arg1[%c15] : memref<98xf32, #tpu.memory_space<smem>>
    %123 = vector.extract_strided_slice %99 {offsets = [0, 33], sizes = [2, 256], strides = [1, 1]} : vector<2x358xf32> to vector<2x256xf32>
    %124 = vector.broadcast %122 : f32 to vector<2x256xf32>
    %125 = arith.mulf %124, %123 : vector<2x256xf32>
    %126 = arith.addf %106, %125 : vector<2x256xf32>
    %c64 = arith.constant 64 : index
    %127 = memref.load %arg1[%c64] : memref<98xf32, #tpu.memory_space<smem>>
    %128 = vector.extract_strided_slice %101 {offsets = [0, 33], sizes = [2, 256], strides = [1, 1]} : vector<2x358xf32> to vector<2x256xf32>
    %129 = vector.broadcast %127 : f32 to vector<2x256xf32>
    %130 = arith.mulf %129, %128 : vector<2x256xf32>
    %131 = arith.addf %111, %130 : vector<2x256xf32>
    %c22 = arith.constant 22 : index
    %132 = memref.load %arg1[%c22] : memref<98xf32, #tpu.memory_space<smem>>
    %133 = vector.extract_strided_slice %99 {offsets = [0, 49], sizes = [2, 256], strides = [1, 1]} : vector<2x358xf32> to vector<2x256xf32>
    %134 = vector.broadcast %132 : f32 to vector<2x256xf32>
    %135 = arith.mulf %134, %133 : vector<2x256xf32>
    %136 = arith.addf %116, %135 : vector<2x256xf32>
    %c71 = arith.constant 71 : index
    %137 = memref.load %arg1[%c71] : memref<98xf32, #tpu.memory_space<smem>>
    %138 = vector.extract_strided_slice %101 {offsets = [0, 49], sizes = [2, 256], strides = [1, 1]} : vector<2x358xf32> to vector<2x256xf32>
    %139 = vector.broadcast %137 : f32 to vector<2x256xf32>
    %140 = arith.mulf %139, %138 : vector<2x256xf32>
    %141 = arith.addf %121, %140 : vector<2x256xf32>
    %c29 = arith.constant 29 : index
    %142 = memref.load %arg1[%c29] : memref<98xf32, #tpu.memory_space<smem>>
    %143 = vector.extract_strided_slice %99 {offsets = [0, 65], sizes = [2, 256], strides = [1, 1]} : vector<2x358xf32> to vector<2x256xf32>
    %144 = vector.broadcast %142 : f32 to vector<2x256xf32>
    %145 = arith.mulf %144, %143 : vector<2x256xf32>
    %146 = arith.addf %126, %145 : vector<2x256xf32>
    %c78 = arith.constant 78 : index
    %147 = memref.load %arg1[%c78] : memref<98xf32, #tpu.memory_space<smem>>
    %148 = vector.extract_strided_slice %101 {offsets = [0, 65], sizes = [2, 256], strides = [1, 1]} : vector<2x358xf32> to vector<2x256xf32>
    %149 = vector.broadcast %147 : f32 to vector<2x256xf32>
    %150 = arith.mulf %149, %148 : vector<2x256xf32>
    %151 = arith.addf %131, %150 : vector<2x256xf32>
    %c36 = arith.constant 36 : index
    %152 = memref.load %arg1[%c36] : memref<98xf32, #tpu.memory_space<smem>>
    %153 = vector.extract_strided_slice %99 {offsets = [0, 81], sizes = [2, 256], strides = [1, 1]} : vector<2x358xf32> to vector<2x256xf32>
    %154 = vector.broadcast %152 : f32 to vector<2x256xf32>
    %155 = arith.mulf %154, %153 : vector<2x256xf32>
    %156 = arith.addf %136, %155 : vector<2x256xf32>
    %c85 = arith.constant 85 : index
    %157 = memref.load %arg1[%c85] : memref<98xf32, #tpu.memory_space<smem>>
    %158 = vector.extract_strided_slice %101 {offsets = [0, 81], sizes = [2, 256], strides = [1, 1]} : vector<2x358xf32> to vector<2x256xf32>
    %159 = vector.broadcast %157 : f32 to vector<2x256xf32>
    %160 = arith.mulf %159, %158 : vector<2x256xf32>
    %161 = arith.addf %141, %160 : vector<2x256xf32>
    %c43 = arith.constant 43 : index
    %162 = memref.load %arg1[%c43] : memref<98xf32, #tpu.memory_space<smem>>
    %163 = vector.extract_strided_slice %99 {offsets = [0, 97], sizes = [2, 256], strides = [1, 1]} : vector<2x358xf32> to vector<2x256xf32>
    %164 = vector.broadcast %162 : f32 to vector<2x256xf32>
    %165 = arith.mulf %164, %163 : vector<2x256xf32>
    %166 = arith.addf %146, %165 : vector<2x256xf32>
    %c92 = arith.constant 92 : index
    %167 = memref.load %arg1[%c92] : memref<98xf32, #tpu.memory_space<smem>>
    %168 = vector.extract_strided_slice %101 {offsets = [0, 97], sizes = [2, 256], strides = [1, 1]} : vector<2x358xf32> to vector<2x256xf32>
    %169 = vector.broadcast %167 : f32 to vector<2x256xf32>
    %170 = arith.mulf %169, %168 : vector<2x256xf32>
    %171 = arith.addf %151, %170 : vector<2x256xf32>
    %c2 = arith.constant 2 : index
    %c0_30 = arith.constant 0 : index
    %172 = vector.load %arg2[%c2, %c0_30] : memref<7x358xf32, #tpu.memory_space<vmem>>, vector<1x358xf32>
    %173 = vector.broadcast %172 : vector<1x358xf32> to vector<2x358xf32>
    %174 = arith.mulf %15, %173 : vector<2x358xf32>
    %175 = vector.broadcast %172 : vector<1x358xf32> to vector<2x358xf32>
    %176 = arith.mulf %17, %175 : vector<2x358xf32>
    %c2_31 = arith.constant 2 : index
    %177 = memref.load %arg1[%c2_31] : memref<98xf32, #tpu.memory_space<smem>>
    %178 = vector.extract_strided_slice %174 {offsets = [0, 2], sizes = [2, 256], strides = [1, 1]} : vector<2x358xf32> to vector<2x256xf32>
    %179 = vector.broadcast %177 : f32 to vector<2x256xf32>
    %180 = arith.mulf %179, %178 : vector<2x256xf32>
    %181 = arith.addf %166, %180 : vector<2x256xf32>
    %c51_32 = arith.constant 51 : index
    %182 = memref.load %arg1[%c51_32] : memref<98xf32, #tpu.memory_space<smem>>
    %183 = vector.extract_strided_slice %176 {offsets = [0, 2], sizes = [2, 256], strides = [1, 1]} : vector<2x358xf32> to vector<2x256xf32>
    %184 = vector.broadcast %182 : f32 to vector<2x256xf32>
    %185 = arith.mulf %184, %183 : vector<2x256xf32>
    %186 = arith.addf %171, %185 : vector<2x256xf32>
    %c9 = arith.constant 9 : index
    %187 = memref.load %arg1[%c9] : memref<98xf32, #tpu.memory_space<smem>>
    %188 = vector.extract_strided_slice %174 {offsets = [0, 18], sizes = [2, 256], strides = [1, 1]} : vector<2x358xf32> to vector<2x256xf32>
    %189 = vector.broadcast %187 : f32 to vector<2x256xf32>
    %190 = arith.mulf %189, %188 : vector<2x256xf32>
    %191 = arith.addf %156, %190 : vector<2x256xf32>
    %c58 = arith.constant 58 : index
    %192 = memref.load %arg1[%c58] : memref<98xf32, #tpu.memory_space<smem>>
    %193 = vector.extract_strided_slice %176 {offsets = [0, 18], sizes = [2, 256], strides = [1, 1]} : vector<2x358xf32> to vector<2x256xf32>
    %194 = vector.broadcast %192 : f32 to vector<2x256xf32>
    %195 = arith.mulf %194, %193 : vector<2x256xf32>
    %196 = arith.addf %161, %195 : vector<2x256xf32>
    %c16 = arith.constant 16 : index
    %197 = memref.load %arg1[%c16] : memref<98xf32, #tpu.memory_space<smem>>
    %198 = vector.extract_strided_slice %174 {offsets = [0, 34], sizes = [2, 256], strides = [1, 1]} : vector<2x358xf32> to vector<2x256xf32>
    %199 = vector.broadcast %197 : f32 to vector<2x256xf32>
    %200 = arith.mulf %199, %198 : vector<2x256xf32>
    %201 = arith.addf %181, %200 : vector<2x256xf32>
    %c65 = arith.constant 65 : index
    %202 = memref.load %arg1[%c65] : memref<98xf32, #tpu.memory_space<smem>>
    %203 = vector.extract_strided_slice %176 {offsets = [0, 34], sizes = [2, 256], strides = [1, 1]} : vector<2x358xf32> to vector<2x256xf32>
    %204 = vector.broadcast %202 : f32 to vector<2x256xf32>
    %205 = arith.mulf %204, %203 : vector<2x256xf32>
    %206 = arith.addf %186, %205 : vector<2x256xf32>
    %c23 = arith.constant 23 : index
    %207 = memref.load %arg1[%c23] : memref<98xf32, #tpu.memory_space<smem>>
    %208 = vector.extract_strided_slice %174 {offsets = [0, 50], sizes = [2, 256], strides = [1, 1]} : vector<2x358xf32> to vector<2x256xf32>
    %209 = vector.broadcast %207 : f32 to vector<2x256xf32>
    %210 = arith.mulf %209, %208 : vector<2x256xf32>
    %211 = arith.addf %191, %210 : vector<2x256xf32>
    %c72 = arith.constant 72 : index
    %212 = memref.load %arg1[%c72] : memref<98xf32, #tpu.memory_space<smem>>
    %213 = vector.extract_strided_slice %176 {offsets = [0, 50], sizes = [2, 256], strides = [1, 1]} : vector<2x358xf32> to vector<2x256xf32>
    %214 = vector.broadcast %212 : f32 to vector<2x256xf32>
    %215 = arith.mulf %214, %213 : vector<2x256xf32>
    %216 = arith.addf %196, %215 : vector<2x256xf32>
    %c30 = arith.constant 30 : index
    %217 = memref.load %arg1[%c30] : memref<98xf32, #tpu.memory_space<smem>>
    %218 = vector.extract_strided_slice %174 {offsets = [0, 66], sizes = [2, 256], strides = [1, 1]} : vector<2x358xf32> to vector<2x256xf32>
    %219 = vector.broadcast %217 : f32 to vector<2x256xf32>
    %220 = arith.mulf %219, %218 : vector<2x256xf32>
    %221 = arith.addf %201, %220 : vector<2x256xf32>
    %c79 = arith.constant 79 : index
    %222 = memref.load %arg1[%c79] : memref<98xf32, #tpu.memory_space<smem>>
    %223 = vector.extract_strided_slice %176 {offsets = [0, 66], sizes = [2, 256], strides = [1, 1]} : vector<2x358xf32> to vector<2x256xf32>
    %224 = vector.broadcast %222 : f32 to vector<2x256xf32>
    %225 = arith.mulf %224, %223 : vector<2x256xf32>
    %226 = arith.addf %206, %225 : vector<2x256xf32>
    %c37 = arith.constant 37 : index
    %227 = memref.load %arg1[%c37] : memref<98xf32, #tpu.memory_space<smem>>
    %228 = vector.extract_strided_slice %174 {offsets = [0, 82], sizes = [2, 256], strides = [1, 1]} : vector<2x358xf32> to vector<2x256xf32>
    %229 = vector.broadcast %227 : f32 to vector<2x256xf32>
    %230 = arith.mulf %229, %228 : vector<2x256xf32>
    %231 = arith.addf %211, %230 : vector<2x256xf32>
    %c86 = arith.constant 86 : index
    %232 = memref.load %arg1[%c86] : memref<98xf32, #tpu.memory_space<smem>>
    %233 = vector.extract_strided_slice %176 {offsets = [0, 82], sizes = [2, 256], strides = [1, 1]} : vector<2x358xf32> to vector<2x256xf32>
    %234 = vector.broadcast %232 : f32 to vector<2x256xf32>
    %235 = arith.mulf %234, %233 : vector<2x256xf32>
    %236 = arith.addf %216, %235 : vector<2x256xf32>
    %c44 = arith.constant 44 : index
    %237 = memref.load %arg1[%c44] : memref<98xf32, #tpu.memory_space<smem>>
    %238 = vector.extract_strided_slice %174 {offsets = [0, 98], sizes = [2, 256], strides = [1, 1]} : vector<2x358xf32> to vector<2x256xf32>
    %239 = vector.broadcast %237 : f32 to vector<2x256xf32>
    %240 = arith.mulf %239, %238 : vector<2x256xf32>
    %241 = arith.addf %221, %240 : vector<2x256xf32>
    %c93 = arith.constant 93 : index
    %242 = memref.load %arg1[%c93] : memref<98xf32, #tpu.memory_space<smem>>
    %243 = vector.extract_strided_slice %176 {offsets = [0, 98], sizes = [2, 256], strides = [1, 1]} : vector<2x358xf32> to vector<2x256xf32>
    %244 = vector.broadcast %242 : f32 to vector<2x256xf32>
    %245 = arith.mulf %244, %243 : vector<2x256xf32>
    %246 = arith.addf %226, %245 : vector<2x256xf32>
    %c3 = arith.constant 3 : index
    %c0_33 = arith.constant 0 : index
    %247 = vector.load %arg2[%c3, %c0_33] : memref<7x358xf32, #tpu.memory_space<vmem>>, vector<1x358xf32>
    %248 = vector.broadcast %247 : vector<1x358xf32> to vector<2x358xf32>
    %249 = arith.mulf %15, %248 : vector<2x358xf32>
    %250 = vector.broadcast %247 : vector<1x358xf32> to vector<2x358xf32>
    %251 = arith.mulf %17, %250 : vector<2x358xf32>
    %c3_34 = arith.constant 3 : index
    %252 = memref.load %arg1[%c3_34] : memref<98xf32, #tpu.memory_space<smem>>
    %253 = vector.extract_strided_slice %249 {offsets = [0, 3], sizes = [2, 256], strides = [1, 1]} : vector<2x358xf32> to vector<2x256xf32>
    %254 = vector.broadcast %252 : f32 to vector<2x256xf32>
    %255 = arith.mulf %254, %253 : vector<2x256xf32>
    %256 = arith.addf %241, %255 : vector<2x256xf32>
    %c52 = arith.constant 52 : index
    %257 = memref.load %arg1[%c52] : memref<98xf32, #tpu.memory_space<smem>>
    %258 = vector.extract_strided_slice %251 {offsets = [0, 3], sizes = [2, 256], strides = [1, 1]} : vector<2x358xf32> to vector<2x256xf32>
    %259 = vector.broadcast %257 : f32 to vector<2x256xf32>
    %260 = arith.mulf %259, %258 : vector<2x256xf32>
    %261 = arith.addf %246, %260 : vector<2x256xf32>
    %c10 = arith.constant 10 : index
    %262 = memref.load %arg1[%c10] : memref<98xf32, #tpu.memory_space<smem>>
    %263 = vector.extract_strided_slice %249 {offsets = [0, 19], sizes = [2, 256], strides = [1, 1]} : vector<2x358xf32> to vector<2x256xf32>
    %264 = vector.broadcast %262 : f32 to vector<2x256xf32>
    %265 = arith.mulf %264, %263 : vector<2x256xf32>
    %266 = arith.addf %231, %265 : vector<2x256xf32>
    %c59 = arith.constant 59 : index
    %267 = memref.load %arg1[%c59] : memref<98xf32, #tpu.memory_space<smem>>
    %268 = vector.extract_strided_slice %251 {offsets = [0, 19], sizes = [2, 256], strides = [1, 1]} : vector<2x358xf32> to vector<2x256xf32>
    %269 = vector.broadcast %267 : f32 to vector<2x256xf32>
    %270 = arith.mulf %269, %268 : vector<2x256xf32>
    %271 = arith.addf %236, %270 : vector<2x256xf32>
    %c17 = arith.constant 17 : index
    %272 = memref.load %arg1[%c17] : memref<98xf32, #tpu.memory_space<smem>>
    %273 = vector.extract_strided_slice %249 {offsets = [0, 35], sizes = [2, 256], strides = [1, 1]} : vector<2x358xf32> to vector<2x256xf32>
    %274 = vector.broadcast %272 : f32 to vector<2x256xf32>
    %275 = arith.mulf %274, %273 : vector<2x256xf32>
    %276 = arith.addf %256, %275 : vector<2x256xf32>
    %c66 = arith.constant 66 : index
    %277 = memref.load %arg1[%c66] : memref<98xf32, #tpu.memory_space<smem>>
    %278 = vector.extract_strided_slice %251 {offsets = [0, 35], sizes = [2, 256], strides = [1, 1]} : vector<2x358xf32> to vector<2x256xf32>
    %279 = vector.broadcast %277 : f32 to vector<2x256xf32>
    %280 = arith.mulf %279, %278 : vector<2x256xf32>
    %281 = arith.addf %261, %280 : vector<2x256xf32>
    %c24 = arith.constant 24 : index
    %282 = memref.load %arg1[%c24] : memref<98xf32, #tpu.memory_space<smem>>
    %283 = vector.extract_strided_slice %249 {offsets = [0, 51], sizes = [2, 256], strides = [1, 1]} : vector<2x358xf32> to vector<2x256xf32>
    %284 = vector.broadcast %282 : f32 to vector<2x256xf32>
    %285 = arith.mulf %284, %283 : vector<2x256xf32>
    %286 = arith.addf %266, %285 : vector<2x256xf32>
    %c73 = arith.constant 73 : index
    %287 = memref.load %arg1[%c73] : memref<98xf32, #tpu.memory_space<smem>>
    %288 = vector.extract_strided_slice %251 {offsets = [0, 51], sizes = [2, 256], strides = [1, 1]} : vector<2x358xf32> to vector<2x256xf32>
    %289 = vector.broadcast %287 : f32 to vector<2x256xf32>
    %290 = arith.mulf %289, %288 : vector<2x256xf32>
    %291 = arith.addf %271, %290 : vector<2x256xf32>
    %c31 = arith.constant 31 : index
    %292 = memref.load %arg1[%c31] : memref<98xf32, #tpu.memory_space<smem>>
    %293 = vector.extract_strided_slice %249 {offsets = [0, 67], sizes = [2, 256], strides = [1, 1]} : vector<2x358xf32> to vector<2x256xf32>
    %294 = vector.broadcast %292 : f32 to vector<2x256xf32>
    %295 = arith.mulf %294, %293 : vector<2x256xf32>
    %296 = arith.addf %276, %295 : vector<2x256xf32>
    %c80 = arith.constant 80 : index
    %297 = memref.load %arg1[%c80] : memref<98xf32, #tpu.memory_space<smem>>
    %298 = vector.extract_strided_slice %251 {offsets = [0, 67], sizes = [2, 256], strides = [1, 1]} : vector<2x358xf32> to vector<2x256xf32>
    %299 = vector.broadcast %297 : f32 to vector<2x256xf32>
    %300 = arith.mulf %299, %298 : vector<2x256xf32>
    %301 = arith.addf %281, %300 : vector<2x256xf32>
    %c38 = arith.constant 38 : index
    %302 = memref.load %arg1[%c38] : memref<98xf32, #tpu.memory_space<smem>>
    %303 = vector.extract_strided_slice %249 {offsets = [0, 83], sizes = [2, 256], strides = [1, 1]} : vector<2x358xf32> to vector<2x256xf32>
    %304 = vector.broadcast %302 : f32 to vector<2x256xf32>
    %305 = arith.mulf %304, %303 : vector<2x256xf32>
    %306 = arith.addf %286, %305 : vector<2x256xf32>
    %c87 = arith.constant 87 : index
    %307 = memref.load %arg1[%c87] : memref<98xf32, #tpu.memory_space<smem>>
    %308 = vector.extract_strided_slice %251 {offsets = [0, 83], sizes = [2, 256], strides = [1, 1]} : vector<2x358xf32> to vector<2x256xf32>
    %309 = vector.broadcast %307 : f32 to vector<2x256xf32>
    %310 = arith.mulf %309, %308 : vector<2x256xf32>
    %311 = arith.addf %291, %310 : vector<2x256xf32>
    %c45 = arith.constant 45 : index
    %312 = memref.load %arg1[%c45] : memref<98xf32, #tpu.memory_space<smem>>
    %313 = vector.extract_strided_slice %249 {offsets = [0, 99], sizes = [2, 256], strides = [1, 1]} : vector<2x358xf32> to vector<2x256xf32>
    %314 = vector.broadcast %312 : f32 to vector<2x256xf32>
    %315 = arith.mulf %314, %313 : vector<2x256xf32>
    %316 = arith.addf %296, %315 : vector<2x256xf32>
    %c94 = arith.constant 94 : index
    %317 = memref.load %arg1[%c94] : memref<98xf32, #tpu.memory_space<smem>>
    %318 = vector.extract_strided_slice %251 {offsets = [0, 99], sizes = [2, 256], strides = [1, 1]} : vector<2x358xf32> to vector<2x256xf32>
    %319 = vector.broadcast %317 : f32 to vector<2x256xf32>
    %320 = arith.mulf %319, %318 : vector<2x256xf32>
    %321 = arith.addf %301, %320 : vector<2x256xf32>
    %c4 = arith.constant 4 : index
    %c0_35 = arith.constant 0 : index
    %322 = vector.load %arg2[%c4, %c0_35] : memref<7x358xf32, #tpu.memory_space<vmem>>, vector<1x358xf32>
    %323 = vector.broadcast %322 : vector<1x358xf32> to vector<2x358xf32>
    %324 = arith.mulf %15, %323 : vector<2x358xf32>
    %325 = vector.broadcast %322 : vector<1x358xf32> to vector<2x358xf32>
    %326 = arith.mulf %17, %325 : vector<2x358xf32>
    %c4_36 = arith.constant 4 : index
    %327 = memref.load %arg1[%c4_36] : memref<98xf32, #tpu.memory_space<smem>>
    %328 = vector.extract_strided_slice %324 {offsets = [0, 4], sizes = [2, 256], strides = [1, 1]} : vector<2x358xf32> to vector<2x256xf32>
    %329 = vector.broadcast %327 : f32 to vector<2x256xf32>
    %330 = arith.mulf %329, %328 : vector<2x256xf32>
    %331 = arith.addf %316, %330 : vector<2x256xf32>
    %c53 = arith.constant 53 : index
    %332 = memref.load %arg1[%c53] : memref<98xf32, #tpu.memory_space<smem>>
    %333 = vector.extract_strided_slice %326 {offsets = [0, 4], sizes = [2, 256], strides = [1, 1]} : vector<2x358xf32> to vector<2x256xf32>
    %334 = vector.broadcast %332 : f32 to vector<2x256xf32>
    %335 = arith.mulf %334, %333 : vector<2x256xf32>
    %336 = arith.addf %321, %335 : vector<2x256xf32>
    %c11 = arith.constant 11 : index
    %337 = memref.load %arg1[%c11] : memref<98xf32, #tpu.memory_space<smem>>
    %338 = vector.extract_strided_slice %324 {offsets = [0, 20], sizes = [2, 256], strides = [1, 1]} : vector<2x358xf32> to vector<2x256xf32>
    %339 = vector.broadcast %337 : f32 to vector<2x256xf32>
    %340 = arith.mulf %339, %338 : vector<2x256xf32>
    %341 = arith.addf %306, %340 : vector<2x256xf32>
    %c60 = arith.constant 60 : index
    %342 = memref.load %arg1[%c60] : memref<98xf32, #tpu.memory_space<smem>>
    %343 = vector.extract_strided_slice %326 {offsets = [0, 20], sizes = [2, 256], strides = [1, 1]} : vector<2x358xf32> to vector<2x256xf32>
    %344 = vector.broadcast %342 : f32 to vector<2x256xf32>
    %345 = arith.mulf %344, %343 : vector<2x256xf32>
    %346 = arith.addf %311, %345 : vector<2x256xf32>
    %c18 = arith.constant 18 : index
    %347 = memref.load %arg1[%c18] : memref<98xf32, #tpu.memory_space<smem>>
    %348 = vector.extract_strided_slice %324 {offsets = [0, 36], sizes = [2, 256], strides = [1, 1]} : vector<2x358xf32> to vector<2x256xf32>
    %349 = vector.broadcast %347 : f32 to vector<2x256xf32>
    %350 = arith.mulf %349, %348 : vector<2x256xf32>
    %351 = arith.addf %331, %350 : vector<2x256xf32>
    %c67 = arith.constant 67 : index
    %352 = memref.load %arg1[%c67] : memref<98xf32, #tpu.memory_space<smem>>
    %353 = vector.extract_strided_slice %326 {offsets = [0, 36], sizes = [2, 256], strides = [1, 1]} : vector<2x358xf32> to vector<2x256xf32>
    %354 = vector.broadcast %352 : f32 to vector<2x256xf32>
    %355 = arith.mulf %354, %353 : vector<2x256xf32>
    %356 = arith.addf %336, %355 : vector<2x256xf32>
    %c25 = arith.constant 25 : index
    %357 = memref.load %arg1[%c25] : memref<98xf32, #tpu.memory_space<smem>>
    %358 = vector.extract_strided_slice %324 {offsets = [0, 52], sizes = [2, 256], strides = [1, 1]} : vector<2x358xf32> to vector<2x256xf32>
    %359 = vector.broadcast %357 : f32 to vector<2x256xf32>
    %360 = arith.mulf %359, %358 : vector<2x256xf32>
    %361 = arith.addf %341, %360 : vector<2x256xf32>
    %c74 = arith.constant 74 : index
    %362 = memref.load %arg1[%c74] : memref<98xf32, #tpu.memory_space<smem>>
    %363 = vector.extract_strided_slice %326 {offsets = [0, 52], sizes = [2, 256], strides = [1, 1]} : vector<2x358xf32> to vector<2x256xf32>
    %364 = vector.broadcast %362 : f32 to vector<2x256xf32>
    %365 = arith.mulf %364, %363 : vector<2x256xf32>
    %366 = arith.addf %346, %365 : vector<2x256xf32>
    %c32 = arith.constant 32 : index
    %367 = memref.load %arg1[%c32] : memref<98xf32, #tpu.memory_space<smem>>
    %368 = vector.extract_strided_slice %324 {offsets = [0, 68], sizes = [2, 256], strides = [1, 1]} : vector<2x358xf32> to vector<2x256xf32>
    %369 = vector.broadcast %367 : f32 to vector<2x256xf32>
    %370 = arith.mulf %369, %368 : vector<2x256xf32>
    %371 = arith.addf %351, %370 : vector<2x256xf32>
    %c81 = arith.constant 81 : index
    %372 = memref.load %arg1[%c81] : memref<98xf32, #tpu.memory_space<smem>>
    %373 = vector.extract_strided_slice %326 {offsets = [0, 68], sizes = [2, 256], strides = [1, 1]} : vector<2x358xf32> to vector<2x256xf32>
    %374 = vector.broadcast %372 : f32 to vector<2x256xf32>
    %375 = arith.mulf %374, %373 : vector<2x256xf32>
    %376 = arith.addf %356, %375 : vector<2x256xf32>
    %c39 = arith.constant 39 : index
    %377 = memref.load %arg1[%c39] : memref<98xf32, #tpu.memory_space<smem>>
    %378 = vector.extract_strided_slice %324 {offsets = [0, 84], sizes = [2, 256], strides = [1, 1]} : vector<2x358xf32> to vector<2x256xf32>
    %379 = vector.broadcast %377 : f32 to vector<2x256xf32>
    %380 = arith.mulf %379, %378 : vector<2x256xf32>
    %381 = arith.addf %361, %380 : vector<2x256xf32>
    %c88 = arith.constant 88 : index
    %382 = memref.load %arg1[%c88] : memref<98xf32, #tpu.memory_space<smem>>
    %383 = vector.extract_strided_slice %326 {offsets = [0, 84], sizes = [2, 256], strides = [1, 1]} : vector<2x358xf32> to vector<2x256xf32>
    %384 = vector.broadcast %382 : f32 to vector<2x256xf32>
    %385 = arith.mulf %384, %383 : vector<2x256xf32>
    %386 = arith.addf %366, %385 : vector<2x256xf32>
    %c46 = arith.constant 46 : index
    %387 = memref.load %arg1[%c46] : memref<98xf32, #tpu.memory_space<smem>>
    %388 = vector.extract_strided_slice %324 {offsets = [0, 100], sizes = [2, 256], strides = [1, 1]} : vector<2x358xf32> to vector<2x256xf32>
    %389 = vector.broadcast %387 : f32 to vector<2x256xf32>
    %390 = arith.mulf %389, %388 : vector<2x256xf32>
    %391 = arith.addf %371, %390 : vector<2x256xf32>
    %c95 = arith.constant 95 : index
    %392 = memref.load %arg1[%c95] : memref<98xf32, #tpu.memory_space<smem>>
    %393 = vector.extract_strided_slice %326 {offsets = [0, 100], sizes = [2, 256], strides = [1, 1]} : vector<2x358xf32> to vector<2x256xf32>
    %394 = vector.broadcast %392 : f32 to vector<2x256xf32>
    %395 = arith.mulf %394, %393 : vector<2x256xf32>
    %396 = arith.addf %376, %395 : vector<2x256xf32>
    %c5 = arith.constant 5 : index
    %c0_37 = arith.constant 0 : index
    %397 = vector.load %arg2[%c5, %c0_37] : memref<7x358xf32, #tpu.memory_space<vmem>>, vector<1x358xf32>
    %398 = vector.broadcast %397 : vector<1x358xf32> to vector<2x358xf32>
    %399 = arith.mulf %15, %398 : vector<2x358xf32>
    %400 = vector.broadcast %397 : vector<1x358xf32> to vector<2x358xf32>
    %401 = arith.mulf %17, %400 : vector<2x358xf32>
    %c5_38 = arith.constant 5 : index
    %402 = memref.load %arg1[%c5_38] : memref<98xf32, #tpu.memory_space<smem>>
    %403 = vector.extract_strided_slice %399 {offsets = [0, 5], sizes = [2, 256], strides = [1, 1]} : vector<2x358xf32> to vector<2x256xf32>
    %404 = vector.broadcast %402 : f32 to vector<2x256xf32>
    %405 = arith.mulf %404, %403 : vector<2x256xf32>
    %406 = arith.addf %391, %405 : vector<2x256xf32>
    %c54 = arith.constant 54 : index
    %407 = memref.load %arg1[%c54] : memref<98xf32, #tpu.memory_space<smem>>
    %408 = vector.extract_strided_slice %401 {offsets = [0, 5], sizes = [2, 256], strides = [1, 1]} : vector<2x358xf32> to vector<2x256xf32>
    %409 = vector.broadcast %407 : f32 to vector<2x256xf32>
    %410 = arith.mulf %409, %408 : vector<2x256xf32>
    %411 = arith.addf %396, %410 : vector<2x256xf32>
    %c12 = arith.constant 12 : index
    %412 = memref.load %arg1[%c12] : memref<98xf32, #tpu.memory_space<smem>>
    %413 = vector.extract_strided_slice %399 {offsets = [0, 21], sizes = [2, 256], strides = [1, 1]} : vector<2x358xf32> to vector<2x256xf32>
    %414 = vector.broadcast %412 : f32 to vector<2x256xf32>
    %415 = arith.mulf %414, %413 : vector<2x256xf32>
    %416 = arith.addf %381, %415 : vector<2x256xf32>
    %c61 = arith.constant 61 : index
    %417 = memref.load %arg1[%c61] : memref<98xf32, #tpu.memory_space<smem>>
    %418 = vector.extract_strided_slice %401 {offsets = [0, 21], sizes = [2, 256], strides = [1, 1]} : vector<2x358xf32> to vector<2x256xf32>
    %419 = vector.broadcast %417 : f32 to vector<2x256xf32>
    %420 = arith.mulf %419, %418 : vector<2x256xf32>
    %421 = arith.addf %386, %420 : vector<2x256xf32>
    %c19 = arith.constant 19 : index
    %422 = memref.load %arg1[%c19] : memref<98xf32, #tpu.memory_space<smem>>
    %423 = vector.extract_strided_slice %399 {offsets = [0, 37], sizes = [2, 256], strides = [1, 1]} : vector<2x358xf32> to vector<2x256xf32>
    %424 = vector.broadcast %422 : f32 to vector<2x256xf32>
    %425 = arith.mulf %424, %423 : vector<2x256xf32>
    %426 = arith.addf %406, %425 : vector<2x256xf32>
    %c68 = arith.constant 68 : index
    %427 = memref.load %arg1[%c68] : memref<98xf32, #tpu.memory_space<smem>>
    %428 = vector.extract_strided_slice %401 {offsets = [0, 37], sizes = [2, 256], strides = [1, 1]} : vector<2x358xf32> to vector<2x256xf32>
    %429 = vector.broadcast %427 : f32 to vector<2x256xf32>
    %430 = arith.mulf %429, %428 : vector<2x256xf32>
    %431 = arith.addf %411, %430 : vector<2x256xf32>
    %c26 = arith.constant 26 : index
    %432 = memref.load %arg1[%c26] : memref<98xf32, #tpu.memory_space<smem>>
    %433 = vector.extract_strided_slice %399 {offsets = [0, 53], sizes = [2, 256], strides = [1, 1]} : vector<2x358xf32> to vector<2x256xf32>
    %434 = vector.broadcast %432 : f32 to vector<2x256xf32>
    %435 = arith.mulf %434, %433 : vector<2x256xf32>
    %436 = arith.addf %416, %435 : vector<2x256xf32>
    %c75 = arith.constant 75 : index
    %437 = memref.load %arg1[%c75] : memref<98xf32, #tpu.memory_space<smem>>
    %438 = vector.extract_strided_slice %401 {offsets = [0, 53], sizes = [2, 256], strides = [1, 1]} : vector<2x358xf32> to vector<2x256xf32>
    %439 = vector.broadcast %437 : f32 to vector<2x256xf32>
    %440 = arith.mulf %439, %438 : vector<2x256xf32>
    %441 = arith.addf %421, %440 : vector<2x256xf32>
    %c33 = arith.constant 33 : index
    %442 = memref.load %arg1[%c33] : memref<98xf32, #tpu.memory_space<smem>>
    %443 = vector.extract_strided_slice %399 {offsets = [0, 69], sizes = [2, 256], strides = [1, 1]} : vector<2x358xf32> to vector<2x256xf32>
    %444 = vector.broadcast %442 : f32 to vector<2x256xf32>
    %445 = arith.mulf %444, %443 : vector<2x256xf32>
    %446 = arith.addf %426, %445 : vector<2x256xf32>
    %c82 = arith.constant 82 : index
    %447 = memref.load %arg1[%c82] : memref<98xf32, #tpu.memory_space<smem>>
    %448 = vector.extract_strided_slice %401 {offsets = [0, 69], sizes = [2, 256], strides = [1, 1]} : vector<2x358xf32> to vector<2x256xf32>
    %449 = vector.broadcast %447 : f32 to vector<2x256xf32>
    %450 = arith.mulf %449, %448 : vector<2x256xf32>
    %451 = arith.addf %431, %450 : vector<2x256xf32>
    %c40 = arith.constant 40 : index
    %452 = memref.load %arg1[%c40] : memref<98xf32, #tpu.memory_space<smem>>
    %453 = vector.extract_strided_slice %399 {offsets = [0, 85], sizes = [2, 256], strides = [1, 1]} : vector<2x358xf32> to vector<2x256xf32>
    %454 = vector.broadcast %452 : f32 to vector<2x256xf32>
    %455 = arith.mulf %454, %453 : vector<2x256xf32>
    %456 = arith.addf %436, %455 : vector<2x256xf32>
    %c89 = arith.constant 89 : index
    %457 = memref.load %arg1[%c89] : memref<98xf32, #tpu.memory_space<smem>>
    %458 = vector.extract_strided_slice %401 {offsets = [0, 85], sizes = [2, 256], strides = [1, 1]} : vector<2x358xf32> to vector<2x256xf32>
    %459 = vector.broadcast %457 : f32 to vector<2x256xf32>
    %460 = arith.mulf %459, %458 : vector<2x256xf32>
    %461 = arith.addf %441, %460 : vector<2x256xf32>
    %c47 = arith.constant 47 : index
    %462 = memref.load %arg1[%c47] : memref<98xf32, #tpu.memory_space<smem>>
    %463 = vector.extract_strided_slice %399 {offsets = [0, 101], sizes = [2, 256], strides = [1, 1]} : vector<2x358xf32> to vector<2x256xf32>
    %464 = vector.broadcast %462 : f32 to vector<2x256xf32>
    %465 = arith.mulf %464, %463 : vector<2x256xf32>
    %466 = arith.addf %446, %465 : vector<2x256xf32>
    %c96 = arith.constant 96 : index
    %467 = memref.load %arg1[%c96] : memref<98xf32, #tpu.memory_space<smem>>
    %468 = vector.extract_strided_slice %401 {offsets = [0, 101], sizes = [2, 256], strides = [1, 1]} : vector<2x358xf32> to vector<2x256xf32>
    %469 = vector.broadcast %467 : f32 to vector<2x256xf32>
    %470 = arith.mulf %469, %468 : vector<2x256xf32>
    %471 = arith.addf %451, %470 : vector<2x256xf32>
    %c6 = arith.constant 6 : index
    %c0_39 = arith.constant 0 : index
    %472 = vector.load %arg2[%c6, %c0_39] : memref<7x358xf32, #tpu.memory_space<vmem>>, vector<1x358xf32>
    %473 = vector.broadcast %472 : vector<1x358xf32> to vector<2x358xf32>
    %474 = arith.mulf %15, %473 : vector<2x358xf32>
    %475 = vector.broadcast %472 : vector<1x358xf32> to vector<2x358xf32>
    %476 = arith.mulf %17, %475 : vector<2x358xf32>
    %c6_40 = arith.constant 6 : index
    %477 = memref.load %arg1[%c6_40] : memref<98xf32, #tpu.memory_space<smem>>
    %478 = vector.extract_strided_slice %474 {offsets = [0, 6], sizes = [2, 256], strides = [1, 1]} : vector<2x358xf32> to vector<2x256xf32>
    %479 = vector.broadcast %477 : f32 to vector<2x256xf32>
    %480 = arith.mulf %479, %478 : vector<2x256xf32>
    %481 = arith.addf %466, %480 : vector<2x256xf32>
    %c55 = arith.constant 55 : index
    %482 = memref.load %arg1[%c55] : memref<98xf32, #tpu.memory_space<smem>>
    %483 = vector.extract_strided_slice %476 {offsets = [0, 6], sizes = [2, 256], strides = [1, 1]} : vector<2x358xf32> to vector<2x256xf32>
    %484 = vector.broadcast %482 : f32 to vector<2x256xf32>
    %485 = arith.mulf %484, %483 : vector<2x256xf32>
    %486 = arith.addf %471, %485 : vector<2x256xf32>
    %c13 = arith.constant 13 : index
    %487 = memref.load %arg1[%c13] : memref<98xf32, #tpu.memory_space<smem>>
    %488 = vector.extract_strided_slice %474 {offsets = [0, 22], sizes = [2, 256], strides = [1, 1]} : vector<2x358xf32> to vector<2x256xf32>
    %489 = vector.broadcast %487 : f32 to vector<2x256xf32>
    %490 = arith.mulf %489, %488 : vector<2x256xf32>
    %491 = arith.addf %456, %490 : vector<2x256xf32>
    %c62 = arith.constant 62 : index
    %492 = memref.load %arg1[%c62] : memref<98xf32, #tpu.memory_space<smem>>
    %493 = vector.extract_strided_slice %476 {offsets = [0, 22], sizes = [2, 256], strides = [1, 1]} : vector<2x358xf32> to vector<2x256xf32>
    %494 = vector.broadcast %492 : f32 to vector<2x256xf32>
    %495 = arith.mulf %494, %493 : vector<2x256xf32>
    %496 = arith.addf %461, %495 : vector<2x256xf32>
    %c20 = arith.constant 20 : index
    %497 = memref.load %arg1[%c20] : memref<98xf32, #tpu.memory_space<smem>>
    %498 = vector.extract_strided_slice %474 {offsets = [0, 38], sizes = [2, 256], strides = [1, 1]} : vector<2x358xf32> to vector<2x256xf32>
    %499 = vector.broadcast %497 : f32 to vector<2x256xf32>
    %500 = arith.mulf %499, %498 : vector<2x256xf32>
    %501 = arith.addf %481, %500 : vector<2x256xf32>
    %c69 = arith.constant 69 : index
    %502 = memref.load %arg1[%c69] : memref<98xf32, #tpu.memory_space<smem>>
    %503 = vector.extract_strided_slice %476 {offsets = [0, 38], sizes = [2, 256], strides = [1, 1]} : vector<2x358xf32> to vector<2x256xf32>
    %504 = vector.broadcast %502 : f32 to vector<2x256xf32>
    %505 = arith.mulf %504, %503 : vector<2x256xf32>
    %506 = arith.addf %486, %505 : vector<2x256xf32>
    %c27 = arith.constant 27 : index
    %507 = memref.load %arg1[%c27] : memref<98xf32, #tpu.memory_space<smem>>
    %508 = vector.extract_strided_slice %474 {offsets = [0, 54], sizes = [2, 256], strides = [1, 1]} : vector<2x358xf32> to vector<2x256xf32>
    %509 = vector.broadcast %507 : f32 to vector<2x256xf32>
    %510 = arith.mulf %509, %508 : vector<2x256xf32>
    %511 = arith.addf %491, %510 : vector<2x256xf32>
    %c76 = arith.constant 76 : index
    %512 = memref.load %arg1[%c76] : memref<98xf32, #tpu.memory_space<smem>>
    %513 = vector.extract_strided_slice %476 {offsets = [0, 54], sizes = [2, 256], strides = [1, 1]} : vector<2x358xf32> to vector<2x256xf32>
    %514 = vector.broadcast %512 : f32 to vector<2x256xf32>
    %515 = arith.mulf %514, %513 : vector<2x256xf32>
    %516 = arith.addf %496, %515 : vector<2x256xf32>
    %c34 = arith.constant 34 : index
    %517 = memref.load %arg1[%c34] : memref<98xf32, #tpu.memory_space<smem>>
    %518 = vector.extract_strided_slice %474 {offsets = [0, 70], sizes = [2, 256], strides = [1, 1]} : vector<2x358xf32> to vector<2x256xf32>
    %519 = vector.broadcast %517 : f32 to vector<2x256xf32>
    %520 = arith.mulf %519, %518 : vector<2x256xf32>
    %521 = arith.addf %501, %520 : vector<2x256xf32>
    %c83 = arith.constant 83 : index
    %522 = memref.load %arg1[%c83] : memref<98xf32, #tpu.memory_space<smem>>
    %523 = vector.extract_strided_slice %476 {offsets = [0, 70], sizes = [2, 256], strides = [1, 1]} : vector<2x358xf32> to vector<2x256xf32>
    %524 = vector.broadcast %522 : f32 to vector<2x256xf32>
    %525 = arith.mulf %524, %523 : vector<2x256xf32>
    %526 = arith.addf %506, %525 : vector<2x256xf32>
    %c41 = arith.constant 41 : index
    %527 = memref.load %arg1[%c41] : memref<98xf32, #tpu.memory_space<smem>>
    %528 = vector.extract_strided_slice %474 {offsets = [0, 86], sizes = [2, 256], strides = [1, 1]} : vector<2x358xf32> to vector<2x256xf32>
    %529 = vector.broadcast %527 : f32 to vector<2x256xf32>
    %530 = arith.mulf %529, %528 : vector<2x256xf32>
    %531 = arith.addf %511, %530 : vector<2x256xf32>
    %c90 = arith.constant 90 : index
    %532 = memref.load %arg1[%c90] : memref<98xf32, #tpu.memory_space<smem>>
    %533 = vector.extract_strided_slice %476 {offsets = [0, 86], sizes = [2, 256], strides = [1, 1]} : vector<2x358xf32> to vector<2x256xf32>
    %534 = vector.broadcast %532 : f32 to vector<2x256xf32>
    %535 = arith.mulf %534, %533 : vector<2x256xf32>
    %536 = arith.addf %516, %535 : vector<2x256xf32>
    %c48 = arith.constant 48 : index
    %537 = memref.load %arg1[%c48] : memref<98xf32, #tpu.memory_space<smem>>
    %538 = vector.extract_strided_slice %474 {offsets = [0, 102], sizes = [2, 256], strides = [1, 1]} : vector<2x358xf32> to vector<2x256xf32>
    %539 = vector.broadcast %537 : f32 to vector<2x256xf32>
    %540 = arith.mulf %539, %538 : vector<2x256xf32>
    %541 = arith.addf %521, %540 : vector<2x256xf32>
    %c97 = arith.constant 97 : index
    %542 = memref.load %arg1[%c97] : memref<98xf32, #tpu.memory_space<smem>>
    %543 = vector.extract_strided_slice %476 {offsets = [0, 102], sizes = [2, 256], strides = [1, 1]} : vector<2x358xf32> to vector<2x256xf32>
    %544 = vector.broadcast %542 : f32 to vector<2x256xf32>
    %545 = arith.mulf %544, %543 : vector<2x256xf32>
    %546 = arith.addf %526, %545 : vector<2x256xf32>
    %547 = arith.addf %541, %531 : vector<2x256xf32>
    %548 = arith.addf %546, %536 : vector<2x256xf32>
    %549 = arith.addf %547, %548 : vector<2x256xf32>
    %550 = arith.negf %549 : vector<2x256xf32>
    %551 = math.exp %550 : vector<2x256xf32>
    %cst_41 = arith.constant 1.000000e+00 : f32
    %552 = vector.broadcast %cst_41 : f32 to vector<2x256xf32>
    %553 = arith.addf %552, %551 : vector<2x256xf32>
    %554 = arith.divf %552, %553 : vector<2x256xf32>
    %c0_42 = arith.constant 0 : index
    %c0_43 = arith.constant 0 : index
    %555 = vector.load %arg4[%c0_42, %c0_43] : memref<2x256xf32, #tpu.memory_space<vmem>>, vector<2x256xf32>
    tpu.vector_store %arg4[%c0_42, %c0_43], %554 {strides = array<i32>} : memref<2x256xf32, #tpu.memory_space<vmem>>, vector<2x256xf32>,
    return
  }
  func.func @transform_0(%arg0: i32) -> i32 {
    %c0_i32 = arith.constant 0 : i32
    %c0_i32_0 = arith.constant 0 : i32
    return %c0_i32 : i32
  }
  func.func @transform_1(%arg0: i32) -> (i32, i32) {
    %c0_i32 = arith.constant 0 : i32
    %c0_i32_0 = arith.constant 0 : i32
    %c0_i32_1 = arith.constant 0 : i32
    return %c0_i32, %c0_i32_0 : i32, i32
  }
  func.func @transform_2(%arg0: i32) -> (i32, i32, i32) {
    %c0_i32 = arith.constant 0 : i32
    %c0_i32_0 = arith.constant 0 : i32
    %c0_i32_1 = arith.constant 0 : i32
    return %arg0, %c0_i32, %c0_i32_0 : i32, i32, i32
  }
  func.func @transform_3(%arg0: i32) -> (i32, i32) {
    %c0_i32 = arith.constant 0 : i32
    %c0_i32_0 = arith.constant 0 : i32
    return %arg0, %c0_i32 : i32, i32
  }
}

</mosaic_0001>

<bundles_post_ra>
// kernel: tpu_custom_call.1
= control target key start
LH: loop header
LB: loop body
LE: loop exit
PB: predicated region body
PF: predicated region fallthrough
CT: control target
= control target key end

     0   :  { %8 = vsyncpa [#allocation6], 0  ;;  %s2528_s0 = inlined_call_operand.hbm [shape: f32[98], index: 0, kind: input, shape index: {}]   ;;  %s2529_s1 = inlined_call_operand.hbm [shape: f32[7,358], index: 1, kind: input, shape index: {}]   ;;  %s2530_s2 = inlined_call_operand.hbm [shape: f32[2,4,256], index: 2, kind: input, shape index: {}]   ;;  %s2531_s3 = inlined_call_operand.hbm [shape: f32[2,256], index: 3, kind: output, shape index: {}]  }
   0x1   :  { %9 = vsyncpa [#allocation4], 0 }
   0x2   :  { %10 = vsyncpa [#allocation9], 0 }
   0x3   :  { %11 = vsyncpa [#allocation5], 0  ;;  %s1686_s12 = smov [#allocation3]   ;;  %s1687_s15 = smov [#allocation7]  }
   0x4   :  { %19 = dma.hbm_to_smem %s2528_s0, 16, %s1686_s12, [#allocation6]  }
   0x5   :  { %s26_s16 = sshll.u32 %s1687_s15, 4  ;;  %s1688_s17 = smov [#allocation8]   ;;  %s27_s16 = int_to_ptr.vmem [resolvable:$true] %s26_s16 }
   0x6   :  { %s35_s18 = sshll.u32 %s1688_s17, 4  ;;  %s1626_s19 = scalar_lea.vmem %s27_s16, 384  ;;  %s36_s18 = int_to_ptr.vmem [resolvable:$true] %s35_s18 }
   0x7   :  { %p1627_p0 = scmp.ne.s32.totalorder %s27_s16, %s1626_s19  ;;  %p1631_p1 = scmp.lt.s32.totalorder %s27_s16, %s27_s16 }
   0x8   :  { %p1632_p2 = scmp.lt.s32.totalorder %s1626_s19, %s1626_s19 }
   0xa   :  { %p1633_p3 = por %p1632_p2, %p1631_p1 }
   0xc   :  { %p1634_p4 = pnand %p1633_p3, %p1627_p0 }
   0xe   :  { %1637 = shalt.err (!%p1634_p4)
}
   0xf   :  { %29 = dma.hbm_to_vmem [thread:$0]  %s2529_s1, 384, %s27_s16, [#allocation4]  }
  0x10   :  { %s1646_s22 = scalar_lea.vmem %s36_s18, 256  ;;  %p1651_p6 = scmp.lt.s32.totalorder %s36_s18, %s36_s18 }
  0x11   :  { %p1647_p5 = scmp.ne.s32.totalorder %s36_s18, %s1646_s22  ;;  %p1652_p7 = scmp.lt.s32.totalorder %s1646_s22, %s1646_s22 }
  0x13   :  { %p1653_p8 = por %p1652_p7, %p1651_p6 }
  0x15   :  { %p1654_p9 = pnand %p1653_p8, %p1647_p5 }
  0x17   :  { %1657 = shalt.err (!%p1654_p9)
}
  0x18   :  { %s1689_s0 = smov 128   ;;  %s1690_s23 = smov 8  }
  0x19   :  { %41 = dma.hbm_to_vmem [thread:$0]  %s2530_s2, 256, %s36_s18, [#allocation9], %s1689_s0, %s1689_s0, %s1690_s23  }
  0x1a   :  { %1678 = dma.done.wait [#allocation6], 16  }
  0x1b   :  { %1679 = vsyncadd [#allocation6], 4294967280 }
  0x1c   :  { %1680 = dma.done.wait [#allocation4], 384  }
  0x1d   :  { %1681 = vsyncadd [#allocation4], 4294966912 }
  0x1e   :  { %1682 = dma.done.wait [#allocation9], 256  }
  0x1f   :  { %1683 = vsyncadd [#allocation9], 4294967040 }
  0x20   :  { %51 = sfence }
  0x21   :  { %v52_v0 = vld [vmem:[#allocation8] sm:$0xff]  ;;  %v53_v1 = vld [vmem:[#allocation8 + $0x8] sm:$0xff]  ;;  %vm60_vm0 = vcmask 1043456   ;;  %v136_v2 = vlaneseq  ;;  %v1691_v9 = vmov 1983009808   ;;  %vm122_vm1 = vcmask 410624  }
  0x22   :  { %v56_v3 = vcombine.high %v52_v0, %v52_v0  ;;  %v57_v4 = vcombine.high %v53_v1, %v53_v1  ;;  %v94_v5 = vsel %vm60_vm0, %v52_v0, -inf  ;;  %v108_v6 = vsel %vm60_vm0, %v53_v1, -inf  ;;  %s1693_s1 = smov 51   ;;  %s1475_s2 = sld [smem:[#allocation3 + $0x46]] }
  0x23   :  { %v95_v7 = vrot.slane %v94_v5, 4  ;;  %v109_v8 = vrot.slane %v108_v6, 4  ;;  %v134_v10 = vunpack.c.l.s4 %v1691_v9  ;;  %v1756_v13 = vshrl.u32 %v136_v2, 7  ;;  %v209_v9 = vld [vmem:[#allocation7] ss:$8 sm:$0x7] }
  0x24   :  { %v101_v11 = vsel %vm60_vm0, %v56_v3, -inf  ;;  %v115_v12 = vsel %vm60_vm0, %v57_v4, -inf  ;;  %v61_v19 = vsel %vm60_vm0, %v52_v0, 0.0  ;;  %v68_v20 = vsel %vm60_vm0, %v56_v3, 0.0  ;;  %s1479_s26 = sld [smem:[#allocation3 + $0x54]]  ;;  %s1694_s4 = smov 96  }
  0x25   :  { %v96_v14 = vmax.f32 %v94_v5, %v95_v7  ;;  %v102_v15 = vrot.slane %v101_v11, 4  ;;  %v110_v16 = vmax.f32 %v108_v6, %v109_v8  ;;  %v116_v17 = vrot.slane %v115_v12, 4  ;;  %s1485_s27 = sld [smem:[#allocation3 + $0x39]]  ;;  %s1695_s7 = smov 64  }
  0x26   :  { %v135_v18 = vunpack.c.0.s8 %v134_v10  ;;  %v62_v26 = vrot.slane %v61_v19, 4  ;;  %v69_v27 = vrot.slane %v68_v20, 4  ;;  %v75_v28 = vsel %vm60_vm0, %v53_v1, 0.0  ;;  %s1478_s28 = sld [smem:[#allocation3 + $0x23]]  ;;  %s1696_s10 = smov 127  }
  0x27   :  { %v97_v21 = vrot.slane %v96_v14, 2  ;;  %v103_v22 = vmax.f32 %v101_v11, %v102_v15  ;;  %v111_v23 = vrot.slane %v110_v16, 2  ;;  %v117_v24 = vmax.f32 %v115_v12, %v116_v17  ;;  %s1484_s29 = sld [smem:[#allocation3 + $0x8]]  ;;  %s1697_s13 = smov 95  }
  0x28   :  { %v1761_v25 = vsub.s32 %v135_v18, %v1756_v13  ;;  %v63_v33 = vadd.f32 %v62_v26, %v61_v19  ;;  %v70_v34 = vadd.f32 %v69_v27, %v68_v20  ;;  %v76_v35 = vrot.slane %v75_v28, 4  ;;  %s1489_s30 = sld [smem:[#allocation3 + $0x47]]  ;;  %s1698_s16 = smov 63  }
  0x29   :  { %v98_v29 = vmax.f32 %v96_v14, %v97_v21  ;;  %v104_v30 = vrot.slane %v103_v22, 2  ;;  %v112_v31 = vmax.f32 %v110_v16, %v111_v23  ;;  %v118_v32 = vrot.slane %v117_v24, 2  ;;  %v362_v16 = vld [vmem:[#allocation7 + $0x1] ss:$8 sm:$0x7]  ;;  %s1488_s5 = sld [smem:[#allocation3 + $0x16]] }
  0x2a   :  { %v82_v36 = vsel %vm60_vm0, %v57_v4, 0.0  ;;  %v64_v41 = vrot.slane %v63_v33, 2  ;;  %v71_v42 = vrot.slane %v70_v34, 2  ;;  %v77_v43 = vadd.f32 %v76_v35, %v75_v28  ;;  %v540_v21 = vld [vmem:[#allocation7 + $0x2] ss:$8 sm:$0x7] }
  0x2b   :  { %v99_v37 = vrot.slane %v98_v29, 1  ;;  %v105_v38 = vmax.f32 %v103_v22, %v104_v30  ;;  %v113_v39 = vrot.slane %v112_v31, 1  ;;  %v119_v40 = vmax.f32 %v117_v24, %v118_v32  ;;  %s1493_s6 = sld [smem:[#allocation3 + $0x55]]  ;;  %s1699_s19 = smov 126  }
  0x2c   :  { %v83_v44 = vrot.slane %v82_v36, 4  ;;  %v65_v49 = vadd.f32 %v64_v41, %v63_v33  ;;  %v72_v50 = vadd.f32 %v71_v42, %v70_v34  ;;  %v78_v51 = vrot.slane %v77_v43, 2  ;;  %s1492_s8 = sld [smem:[#allocation3 + $0x24]]  ;;  %s1700_s22 = smov 94  }
  0x2d   :  { %v100_v45 = vmax.f32 %v98_v29, %v99_v37  ;;  %v106_v46 = vrot.slane %v105_v38, 1  ;;  %v114_v47 = vmax.f32 %v112_v31, %v113_v39  ;;  %v120_v48 = vrot.slane %v119_v40, 1  ;;  %v896_v39 = vld [vmem:[#allocation7 + $0x4] ss:$8 sm:$0x7]  ;;  %s1499_s9 = sld [smem:[#allocation3 + $0x3a]] }
  0x2e   :  { %v84_v52 = vadd.f32 %v83_v44, %v82_v36  ;;  %v66_v55 = vrot.slane %v65_v49, 1  ;;  %v73_v56 = vrot.slane %v72_v50, 1  ;;  %v79_v57 = vadd.f32 %v78_v51, %v77_v43  ;;  %s1498_s11 = sld [smem:[#allocation3 + $0x9]]  ;;  %s1701_s24 = smov 62  }
  0x2f   :  { %v107_v53 = vmax.f32 %v105_v38, %v106_v46  ;;  %v121_v54 = vmax.f32 %v119_v40, %v120_v48  ;;  %v1692_v59 = vmov 0.0   ;;  %vm153_vm2 = vcmask 1041409   ;;  %s1503_s12 = sld [smem:[#allocation3 + $0x48]] }
  0x30   :  { %v85_v58 = vrot.slane %v84_v52, 2  ;;  %124 = vst.msk [vmem:[#allocation2 + $0x6] sm:$0x3] %vm122_vm1, %v1692_v59  ;;  %123 = vst.msk [vmem:[#allocation2] sm:$0x3] %vm122_vm1, %v1692_v59  ;;  %vm125_vm3 = vcmask 828824   ;;  %v67_v62 = vadd.f32 %v66_v55, %v65_v49  ;;  %v74_v63 = vadd.f32 %v73_v56, %v72_v50 }
  0x31   :  { %v177_v60 = vcombine.low %v100_v45, %v107_v53  ;;  %v185_v61 = vcombine.low %v114_v47, %v121_v54  ;;  %v80_v0 = vrot.slane %v79_v57, 1  ;;  %127 = vst.msk [vmem:[#allocation2 + $0xa] sm:$0x3] %vm125_vm3, %v1692_v59  ;;  %126 = vst.msk [vmem:[#allocation2 + $0x4] sm:$0x3] %vm125_vm3, %v1692_v59  ;;  %vm155_vm4 = vcmask 1043459  }
  0x32   :  { %v86_v1 = vadd.f32 %v85_v58, %v84_v52  ;;  %vm157_vm5 = vcmask 1045509   ;;  %v90_v6 = vmul.f32 0.25, %v67_v62  ;;  %v91_v7 = vmul.f32 0.25, %v74_v63  ;;  %v1074_v58 = vld [vmem:[#allocation7 + $0x5] ss:$8 sm:$0x7] }
  0x33   :  { %v184_v2 = vrot.slane %v177_v60, %v1761_v25  ;;  %v192_v3 = vrot.slane %v185_v61, %v1761_v25  ;;  %v81_v4 = vadd.f32 %v80_v0, %v79_v57  ;;  %vm159_vm6 = vcmask 1047559   ;;  %s1502_s14 = sld [smem:[#allocation3 + $0x17]] }
  0x34   :  { %v87_v5 = vrot.slane %v86_v1, 1  ;;  %v1768_v10 = vsub.s32 0, %v1756_v13  ;;  %v132_v14 = vcombine.low %v90_v6, %v91_v7  ;;  %v1771_v15 = vsub.s32 1, %v1756_v13  ;;  %s1507_s15 = sld [smem:[#allocation3 + $0x56]] }
  0x35   :  { %v195_v8 = vrot.slane %v192_v3, 7  ;;  %v92_v12 = vmul.f32 0.25, %v81_v4  ;;  %v1776_v19 = vsub.s32 2, %v1756_v13  ;;  %v718_v13 = vld [vmem:[#allocation7 + $0x3] ss:$8 sm:$0x7] }
  0x36   :  { %v88_v11 = vadd.f32 %v87_v5, %v86_v1  ;;  %v214_v18 = vrot.slane %v209_v9, %v1768_v10  ;;  %v367_v20 = vrot.slane %v362_v16, %v1768_v10  ;;  %v139_v24 = vrot.slane %v132_v14, %v1761_v25  ;;  %v1252_v1 = vld [vmem:[#allocation7 + $0x6] ss:$8 sm:$0x7]  ;;  %s1506_s17 = sld [smem:[#allocation3 + $0x25]] }
  0x37   :  { %v196_v17 = vsel %vm153_vm2, %v195_v8, %v184_v2  ;;  %v218_v26 = vrot.slane %v209_v9, %v1771_v15  ;;  %v222_v28 = vrot.slane %v209_v9, %v1776_v19  ;;  %v371_v29 = vrot.slane %v362_v16, %v1771_v15  ;;  %s1513_s18 = sld [smem:[#allocation3 + $0x3b]] }
  0x38   :  { %v197_v22 = vsel %vm155_vm4, %v195_v8, %v196_v17  ;;  %v93_v23 = vmul.f32 0.25, %v88_v11  ;;  %v375_v30 = vrot.slane %v362_v16, %v1776_v19  ;;  %v545_v34 = vrot.slane %v540_v21, %v1768_v10  ;;  %s1512_s20 = sld [smem:[#allocation3 + $0xa]] }
  0x39   :  { %v198_v27 = vsel %vm157_vm5, %v195_v8, %v197_v22  ;;  %v223_v33 = vcombine.low %v214_v18, %v218_v26  ;;  %v237_v35 = vrot.slane %v222_v28, %v1761_v25  ;;  %v376_v36 = vcombine.low %v367_v20, %v371_v29  ;;  %s1517_s21 = sld [smem:[#allocation3 + $0x49]] }
  0x3a   :  { %v199_v31 = vsel %vm159_vm6, %v195_v8, %v198_v27  ;;  %v140_v32 = vcombine.low %v92_v12, %v93_v23  ;;  %v390_v37 = vrot.slane %v375_v30, %v1761_v25  ;;  %v549_v38 = vrot.slane %v540_v21, %v1771_v15  ;;  %s1516_s0 = sld [smem:[#allocation3 + $0x18]] }
  0x3b   :  { %200 = vrot.lane.b32.xlu0 %v199_v31, %s1693_s1  ;;  %v230_v41 = vrot.slane %v223_v33, %v1761_v25  ;;  %v553_v42 = vrot.slane %v540_v21, %v1776_v19  ;;  %v723_v43 = vrot.slane %v718_v13, %v1768_v10  ;;  %v383_v44 = vrot.slane %v376_v36, %v1761_v25  ;;  %s1521_s23 = sld [smem:[#allocation3 + $0x57]] }
  0x3c   :  { %v147_v40 = vrot.slane %v140_v32, %v1761_v25  ;;  %v554_v45 = vcombine.low %v545_v34, %v549_v38  ;;  %v727_v46 = vrot.slane %v718_v13, %v1771_v15  ;;  %v731_v47 = vrot.slane %v718_v13, %v1776_v19  ;;  %s1520_s25 = sld [smem:[#allocation3 + $0x26]] }
  0x3d   :  { %v1799_v49 = vcombine.low %v230_v41, %v237_v35  ;;  %v568_v50 = vrot.slane %v553_v42, %v1761_v25  ;;  %v901_v51 = vrot.slane %v896_v39, %v1768_v10  ;;  %v1803_v52 = vcombine.low %v383_v44, %v390_v37 }
  0x3e   :  { %v152_v48 = vrot.slane %v147_v40, 7  ;;  %v561_v53 = vrot.slane %v554_v45, %v1761_v25  ;;  %v732_v54 = vcombine.low %v723_v43, %v727_v46  ;;  %v746_v56 = vrot.slane %v731_v47, %v1761_v25 }
  0x3f   :  { %v905_v57 = vrot.slane %v896_v39, %v1771_v15  ;;  %v909_v63 = vrot.slane %v896_v39, %v1776_v19  ;;  %v1079_v4 = vrot.slane %v1074_v58, %v1768_v10  ;;  %v1083_v7 = vrot.slane %v1074_v58, %v1771_v15 }
  0x40   :  { %v154_v55 = vsel %vm153_vm2, %v152_v48, %v139_v24  ;;  %v1810_v60 = vcombine.low %v561_v53, %v568_v50  ;;  %v739_v61 = vrot.slane %v732_v54, %v1761_v25  ;;  %v1087_v8 = vrot.slane %v1074_v58, %v1776_v19 }
  0x41   :  { %v156_v59 = vsel %vm155_vm4, %v152_v48, %v154_v55  ;;  %v910_v0 = vcombine.low %v901_v51, %v905_v57  ;;  %v924_v6 = vrot.slane %v909_v63, %v1761_v25  ;;  %v1257_v9 = vrot.slane %v1252_v1, %v1768_v10 }
  0x42   :  { %v158_v62 = vsel %vm157_vm5, %v152_v48, %v156_v59  ;;  %v1816_v3 = vcombine.low %v739_v61, %v746_v56  ;;  %v1261_v11 = vrot.slane %v1252_v1, %v1771_v15  ;;  %v1088_v14 = vcombine.low %v1079_v4, %v1083_v7 }
  0x43   :  { %v160_v2 = vsel %vm159_vm6, %v152_v48, %v158_v62  ;;  %v917_v5 = vrot.slane %v910_v0, %v1761_v25  ;;  %v1265_v16 = vrot.slane %v1252_v1, %v1776_v19  ;;  %v1102_v17 = vrot.slane %v1087_v8, %v1761_v25 }
  0x44   :  { %161 = vrot.lane.b32.xlu0 %v160_v2, %s1693_s1  ;;  %v1266_v18 = vcombine.low %v1257_v9, %v1261_v11  ;;  %v1095_v20 = vrot.slane %v1088_v14, %v1761_v25  ;;  %vm167_vm7 = vcmask 1041816   ;;  %vm168_vm8 = vcmask 1043458   ;;  %s1527_s1 = sld [smem:[#allocation3 + $0x3c]] }
  0x45   :  { %v1826_v12 = vcombine.low %v917_v5, %v924_v6  ;;  %v1280_v21 = vrot.slane %v1265_v16, %v1761_v25  ;;  %vm169_vm9 = vmor %vm168_vm8, %vm167_vm7  ;;  %vm170_vm10 = vcmask 414724   ;;  %vm164_vm11 = vcmask 416768  }
  0x46   :  { %v1273_v22 = vrot.slane %v1266_v18, %v1761_v25  ;;  %v1833_v23 = vcombine.low %v1095_v20, %v1102_v17  ;;  %vm171_vm12 = vmor %vm170_vm10, %vm169_vm9  ;;  %v290_v25 = vstv %s1475_s2  ;;  %v331_v32 = vstv %s1479_s26  ;;  %s1702_s2 = smov 125   ;;  %s1526_s26 = sld [smem:[#allocation3 + $0xb]] }
  0x47   :  { %v427_v35 = vstv %s1485_s27  ;;  %v321_v37 = vstv %s1478_s28  ;;  %v417_v41 = vstv %s1484_s29  ;;  %v468_v44 = vstv %s1489_s30  ;;  %s1531_s27 = sld [smem:[#allocation3 + $0x4a]]  ;;  %s1703_s28 = smov 93  }
  0x48   :  { %v1281_v24 = vcombine.low %v1273_v22, %v1280_v21  ;;  %v458_v47 = vstv %s1488_s5  ;;  %v509_v48 = vstv %s1493_s6  ;;  %v499_v51 = vstv %s1492_s8  ;;  %s1530_s29 = sld [smem:[#allocation3 + $0x19]]  ;;  %s1704_s5 = smov 61  }
  0x49   :  { %v605_v53 = vstv %s1499_s9  ;;  %v595_v57 = vstv %s1498_s11  ;;  %v646_v58 = vstv %s1503_s12  ;;  %v636_v62 = vstv %s1502_s14  ;;  %s1535_s30 = sld [smem:[#allocation3 + $0x58]]  ;;  %s1705_s9 = smov 124  }
  0x4a   :  { %v687_v63 = vstv %s1507_s15  ;;  %v677_v1 = vstv %s1506_s17  ;;  %v783_v4 = vstv %s1513_s18  ;;  %v773_v8 = vstv %s1512_s20  ;;  %s1534_s6 = sld [smem:[#allocation3 + $0x27]]  ;;  %s1706_s12 = smov 92  }
  0x4b   :  { %v824_v9 = vstv %s1517_s21  ;;  %v814_v16 = vstv %s1516_s0  ;;  %v865_v17 = vstv %s1521_s23  ;;  %v855_v20 = vstv %s1520_s25  ;;  %s1541_s8 = sld [smem:[#allocation3 + $0x3d]]  ;;  %s1707_s17 = smov 60  }
  0x4c   :  { %v961_v22 = vstv %s1527_s1  ;;  %s1545_s11 = sld [smem:[#allocation3 + $0x4b]]  ;;  %s1708_s21 = smov 123   ;;  %vm265_vm13 = vcmask 785408   ;;  %vm306_vm14 = vcmask 523264   ;;  %vm402_vm15 = vcmask 1039360  }
  0x4d   :  { %s1540_s14 = sld [smem:[#allocation3 + $0xc]]  ;;  %s1709_s25 = smov 91   ;;  %vm443_vm0 = vcmask 777216   ;;  %vm484_vm1 = vcmask 515072   ;;  %vm580_vm2 = vcmask 1031168   ;;  %vm621_vm3 = vcmask 769024  }
  0x4e   :  { %s1549_s15 = sld [smem:[#allocation3 + $0x59]]  ;;  %vm662_vm4 = vcmask 506880   ;;  %vm758_vm5 = vcmask 1022976   ;;  %vm2536_vm6 = vcmask 760832   ;;  %vm2537_vm7 = vcmask 498688  }
  0x4f   :  { %s1544_s18 = sld [smem:[#allocation3 + $0x1a]]  ;;  %vm2538_vm8 = vcmask 1014784   ;;  %vm2533_vm9 = vcmask 752640   ;;  %vm2532_vm10 = vcmask 490496  }
  0x50   :  { %s1555_s20 = sld [smem:[#allocation3 + $0x3e]] }
  0x51   :  { %s1548_s0 = sld [smem:[#allocation3 + $0x28]] }
  0x52   :  { %s1559_s23 = sld [smem:[#allocation3 + $0x4c]] }
  0x53   :  { %s1554_s1 = sld [smem:[#allocation3 + $0xd]] }
  0xad   :  { %v201_v10 = vpop.permute.xlu0 %200 }
  0xae   :  { %v202_v15 = vrot.slane %v201_v10, 6 }
  0xb0   :  { %v203_v19 = vsel %vm164_vm11, %v202_v15, %v201_v10 }
  0xb1   :  { %206 = vst.msk [vmem:[#allocation2 + $0x6] sm:$0x3f] %vm171_vm12, %v203_v19  ;;  %v951_v19 = vstv %s1526_s26  ;;  %s1563_s26 = sld [smem:[#allocation3 + $0x5a]] }
  0xb6   :  { %v162_v26 = vpop.permute.xlu0 %161 }
  0xb7   :  { %v163_v27 = vrot.slane %v162_v26, 6 }
  0xb8   :  { %v1835_v28 = vld [vmem:[#allocation2 + $0x6] sm:$0x3f] }
  0xb9   :  { %v165_v29 = vsel %vm164_vm11, %v163_v27, %v162_v26  ;;  %v1839_v30 = vmul.f32 %v1799_v49, %v1835_v28  ;;  %v1842_v13 = vmul.f32 %v1281_v24, %v1835_v28  ;;  %v1849_v34 = vmul.f32 %v1803_v52, %v1835_v28 }
  0xba   :  { %172 = vst.msk [vmem:[#allocation2] sm:$0x3f] %vm171_vm12, %v165_v29  ;;  %v1897_v2 = vmul.f32 %v1816_v3, %v1835_v28  ;;  %v1917_v21 = vmul.f32 %v1826_v12, %v1835_v28  ;;  %v1002_v26 = vstv %s1531_s27  ;;  %v992_v29 = vstv %s1530_s29  ;;  %s1710_s27 = smov 59   ;;  %s1558_s29 = sld [smem:[#allocation3 + $0x1b]] }
  0xbb   :  { %v291_v31 = vmul.f32 %v290_v25, %v1839_v30  ;;  %v332_v33 = vmul.f32 %v331_v32, %v1839_v30  ;;  %v428_v40 = vmul.f32 %v427_v35, %v1849_v34  ;;  %v469_v46 = vmul.f32 %v468_v44, %v1849_v34 }
  0xbc   :  { %v510_v50 = vmul.f32 %v509_v48, %v1849_v34  ;;  %v784_v7 = vmul.f32 %v783_v4, %v1897_v2  ;;  %v825_v14 = vmul.f32 %v824_v9, %v1897_v2  ;;  %v866_v18 = vmul.f32 %v865_v17, %v1897_v2 }
  0xbd   :  { %293 = vrot.lane.b32.xlu1 %v291_v31, %s1694_s4  ;;  %v962_v15 = vmul.f32 %v961_v22, %v1917_v21  ;;  %v1003_v25 = vmul.f32 %v1002_v26, %v1917_v21  ;;  %v1043_v31 = vstv %s1535_s30  ;;  %v1937_v35 = vmul.f32 %v1833_v23, %v1835_v28  ;;  %s1473_s30 = sld [smem:[#allocation3 + $0x3f]] }
  0xbe   :  { %v1044_v32 = vmul.f32 %v1043_v31, %v1917_v21  ;;  %v1180_v44 = vstv %s1545_s11  ;;  %s1477_s11 = sld [smem:[#allocation3 + $0x4d]]  ;;  %vm2534_vm11 = vcmask 1006592   ;;  %vm1155_vm12 = vcmask 744448  }
  0xc1   :  { %v1851_v36 = vld [vmem:[#allocation2] sm:$0x3f]  ;;  %334 = vrot.lane.b32.xlu1 %v332_v33, %s1695_s7  ;;  %v1033_v33 = vstv %s1534_s6  ;;  %s1711_s6 = smov 122  }
  0xc2   :  { %v1856_v38 = vmul.f32 %v1799_v49, %v1851_v36  ;;  %v1860_v39 = vmul.f32 %v1803_v52, %v1851_v36  ;;  %v1864_v42 = vmul.f32 %v1281_v24, %v1851_v36  ;;  %v1877_v52 = vmul.f32 %v1810_v60, %v1835_v28 }
  0xc3   :  { %v1884_v55 = vmul.f32 %v1810_v60, %v1851_v36  ;;  %v1904_v6 = vmul.f32 %v1816_v3, %v1851_v36  ;;  %v1924_v10 = vmul.f32 %v1826_v12, %v1851_v36  ;;  %v1129_v28 = vstv %s1540_s14  ;;  %s1712_s14 = smov 90  }
  0xc4   :  { %v322_v43 = vmul.f32 %v321_v37, %v1856_v38  ;;  %v418_v45 = vmul.f32 %v417_v41, %v1860_v39  ;;  %v459_v49 = vmul.f32 %v458_v47, %v1860_v39  ;;  %v500_v54 = vmul.f32 %v499_v51, %v1860_v39 }
  0xc5   :  { %430 = vrot.lane.b32.xlu1 %v428_v40, %s1696_s10  ;;  %v606_v56 = vmul.f32 %v605_v53, %v1877_v52  ;;  %v596_v59 = vmul.f32 %v595_v57, %v1884_v55  ;;  %v647_v61 = vmul.f32 %v646_v58, %v1877_v52  ;;  %v637_v60 = vmul.f32 %v636_v62, %v1884_v55 }
  0xc6   :  { %324 = vrot.lane.b32.xlu0 %v322_v43, %s1695_s7  ;;  %v688_v0 = vmul.f32 %v687_v63, %v1877_v52  ;;  %v678_v5 = vmul.f32 %v677_v1, %v1884_v55  ;;  %v774_v11 = vmul.f32 %v773_v8, %v1904_v6  ;;  %v815_v3 = vmul.f32 %v814_v16, %v1904_v6 }
  0xc7   :  { %v856_v24 = vmul.f32 %v855_v20, %v1904_v6  ;;  %v952_v27 = vmul.f32 %v951_v19, %v1924_v10  ;;  %v993_v12 = vmul.f32 %v992_v29, %v1924_v10  ;;  %v1139_v37 = vstv %s1541_s8  ;;  %s1562_s8 = sld [smem:[#allocation3 + $0x29]] }
  0xc8   :  { %v1034_v40 = vmul.f32 %v1033_v33, %v1924_v10  ;;  %v1140_v41 = vmul.f32 %v1139_v37, %v1937_v35  ;;  %v1945_v43 = vmul.f32 %v1833_v23, %v1851_v36  ;;  %v1221_v47 = vstv %s1549_s15  ;;  %s1472_s15 = sld [smem:[#allocation3 + $0xe]] }
  0xc9   :  { %471 = vrot.lane.b32.xlu1 %v469_v46, %s1697_s13  ;;  %v1170_v23 = vstv %s1544_s18  ;;  %v1222_v36 = vmul.f32 %v1221_v47, %v1937_v35  ;;  %s1474_s18 = sld [smem:[#allocation3 + $0x15]] }
  0xca   :  { %420 = vrot.lane.b32.xlu0 %v418_v45, %s1696_s10  ;;  %v1181_v45 = vmul.f32 %v1180_v44, %v1937_v35  ;;  %v1130_v46 = vmul.f32 %v1129_v28, %v1945_v43  ;;  %v1171_v48 = vmul.f32 %v1170_v23, %v1945_v43 }
  0xcd   :  { %512 = vrot.lane.b32.xlu1 %v510_v50, %s1698_s16  ;;  %v1211_v50 = vstv %s1548_s0  ;;  %s1476_s0 = sld [smem:[#allocation3 + $0x1c]] }
  0xce   :  { %461 = vrot.lane.b32.xlu0 %v459_v49, %s1697_s13  ;;  %v1317_v49 = vstv %s1555_s20  ;;  %v1212_v53 = vmul.f32 %v1211_v50, %v1945_v43  ;;  %s1713_s20 = smov 58  }
  0xcf   :  { %v1318_v51 = vmul.f32 %v1317_v49, %v1842_v13 }
  0xd1   :  { %608 = vrot.lane.b32.xlu1 %v606_v56, %s1699_s19  ;;  %v1307_v56 = vstv %s1554_s1  ;;  %s1480_s1 = sld [smem:[#allocation3 + $0x2a]] }
  0xd2   :  { %502 = vrot.lane.b32.xlu0 %v500_v54, %s1698_s16  ;;  %v1358_v54 = vstv %s1559_s23  ;;  %v1308_v58 = vmul.f32 %v1307_v56, %v1864_v42  ;;  %s1481_s23 = sld [smem:[#allocation3 + $0x5b]] }
  0xd3   :  { %v1359_v57 = vmul.f32 %v1358_v54, %v1842_v13 }
  0xd5   :  { %649 = vrot.lane.b32.xlu1 %v647_v61, %s1700_s22  ;;  %v1348_v61 = vstv %s1558_s29  ;;  %s1482_s29 = sld [smem:[#allocation3 + $0x1]] }
  0xd6   :  { %598 = vrot.lane.b32.xlu0 %v596_v59, %s1699_s19  ;;  %v1399_v59 = vstv %s1563_s26  ;;  %v1349_v63 = vmul.f32 %v1348_v61, %v1864_v42  ;;  %s1483_s26 = sld [smem:[#allocation3 + $0x32]] }
  0xd7   :  { %v1400_v62 = vmul.f32 %v1399_v59, %v1842_v13 }
  0xd9   :  { %690 = vrot.lane.b32.xlu1 %v688_v0, %s1701_s24  ;;  %v1389_v0 = vstv %s1562_s8  ;;  %s1486_s8 = sld [smem:[#allocation3 + $0xf]] }
  0xda   :  { %639 = vrot.lane.b32.xlu0 %v637_v60, %s1700_s22  ;;  %v270_v60 = vstv %s1473_s30  ;;  %v1390_v4 = vmul.f32 %v1389_v0, %v1864_v42  ;;  %s1487_s30 = sld [smem:[#allocation3 + $0x40]] }
  0xdb   :  { %v271_v1 = vmul.f32 %v270_v60, %v1839_v30 }
  0xdd   :  { %786 = vrot.lane.b32.xlu1 %v784_v7, %s1702_s2  ;;  %v259_v7 = vstv %s1472_s15  ;;  %s1714_s15 = smov 32  }
  0xde   :  { %680 = vrot.lane.b32.xlu0 %v678_v5, %s1701_s24  ;;  %v311_v5 = vstv %s1477_s11  ;;  %v260_v9 = vmul.f32 %v259_v7, %v1856_v38  ;;  %s1491_s11 = sld [smem:[#allocation3 + $0x4e]] }
  0xdf   :  { %v312_v8 = vmul.f32 %v311_v5, %v1839_v30 }
  0xe1   :  { %827 = vrot.lane.b32.xlu1 %v825_v14, %s1703_s28  ;;  %v300_v14 = vstv %s1476_s0  ;;  %s1497_s0 = sld [smem:[#allocation3 + $0x33]] }
  0xe2   :  { %776 = vrot.lane.b32.xlu0 %v774_v11, %s1702_s2  ;;  %v280_v11 = vstv %s1474_s18  ;;  %v301_v17 = vmul.f32 %v300_v14, %v1856_v38  ;;  %s1490_s18 = sld [smem:[#allocation3 + $0x1d]] }
  0xe3   :  { %v281_v16 = vmul.f32 %v280_v11, %v1856_v38 }
  0xe5   :  { %868 = vrot.lane.b32.xlu1 %v866_v18, %s1704_s5  ;;  %v341_v18 = vstv %s1480_s1  ;;  %s1501_s1 = sld [smem:[#allocation3 + $0x41]] }
  0xe6   :  { %817 = vrot.lane.b32.xlu0 %v815_v3, %s1703_s28  ;;  %v352_v3 = vstv %s1481_s23  ;;  %v342_v22 = vmul.f32 %v341_v18, %v1856_v38  ;;  %s1496_s23 = sld [smem:[#allocation3 + $0x2]] }
  0xe7   :  { %v353_v20 = vmul.f32 %v352_v3, %v1839_v30 }
  0xe9   :  { %964 = vrot.lane.b32.xlu1 %v962_v15, %s1705_s9  ;;  %v396_v15 = vstv %s1482_s29  ;;  %s1715_s29 = smov 31  }
  0xea   :  { %858 = vrot.lane.b32.xlu0 %v856_v24, %s1704_s5  ;;  %v407_v24 = vstv %s1483_s26  ;;  %v397_v26 = vmul.f32 %v396_v15, %v1860_v39  ;;  %s1505_s26 = sld [smem:[#allocation3 + $0x4f]] }
  0xeb   :  { %v408_v19 = vmul.f32 %v407_v24, %v1849_v34 }
  0xed   :  { %1005 = vrot.lane.b32.xlu1 %v1003_v25, %s1706_s12  ;;  %v437_v25 = vstv %s1486_s8  ;;  %s1511_s8 = sld [smem:[#allocation3 + $0x34]] }
  0xee   :  { %954 = vrot.lane.b32.xlu0 %v952_v27, %s1705_s9  ;;  %v448_v27 = vstv %s1487_s30  ;;  %v438_v31 = vmul.f32 %v437_v25, %v1860_v39  ;;  %s1509_s30 = sld [smem:[#allocation3 + $0x5d]] }
  0xef   :  { %v449_v29 = vmul.f32 %v448_v27, %v1849_v34 }
  0xf0   :  { %v667_v50 = vstv %s1505_s26  ;;  %s1532_s26 = sld [smem:[#allocation3 + $0x20]] }
  0xf1   :  { %1046 = vrot.lane.b32.xlu1 %v1044_v32, %s1707_s17  ;;  %v478_v32 = vstv %s1490_s18  ;;  %v668_v54 = vmul.f32 %v667_v50, %v1877_v52  ;;  %s1716_s18 = smov 30  }
  0xf2   :  { %995 = vrot.lane.b32.xlu0 %v993_v12, %s1706_s12  ;;  %v489_v12 = vstv %s1491_s11  ;;  %v479_v37 = vmul.f32 %v478_v32, %v1860_v39  ;;  %s1510_s11 = sld [smem:[#allocation3 + $0x3]] }
  0xf3   :  { %v490_v33 = vmul.f32 %v489_v12, %v1849_v34  ;;  %v763_v60 = vstv %s1511_s8  ;;  %s2106_s8 = sld [smem:[#allocation3 + $0x52]] }
  0xf5   :  { %1142 = vrot.lane.b32.xlu1 %v1140_v41, %s1708_s21 }
  0xf6   :  { %1036 = vrot.lane.b32.xlu0 %v1034_v40, %s1707_s17 }
  0xf8   :  { %v752_v0 = vstv %s1510_s11  ;;  %s2109_s11 = sld [smem:[#allocation3 + $0x21]] }
  0xf9   :  { %1183 = vrot.lane.b32.xlu1 %v1181_v45, %s1709_s25  ;;  %v585_v45 = vstv %s1497_s0  ;;  %v753_v7 = vmul.f32 %v752_v0, %v1904_v6  ;;  %s1525_s0 = sld [smem:[#allocation3 + $0x35]] }
  0xfa   :  { %1132 = vrot.lane.b32.xlu0 %v1130_v46, %s1708_s21  ;;  %v574_v46 = vstv %s1496_s23  ;;  %v586_v47 = vmul.f32 %v585_v45, %v1877_v52  ;;  %s1524_s23 = sld [smem:[#allocation3 + $0x4]] }
  0xfb   :  { %v575_v23 = vmul.f32 %v574_v46, %v1884_v55  ;;  %v1012_v46 = vstv %s1532_s26 }
  0xfc   :  { %v1013_v50 = vmul.f32 %v1012_v46, %v1924_v10 }
  0xfd   :  { %1224 = vrot.lane.b32.xlu1 %v1222_v36, %s1710_s27  ;;  %v626_v36 = vstv %s1501_s1  ;;  %s1528_s1 = sld [smem:[#allocation3 + $0x12]] }
  0xfe   :  { %1173 = vrot.lane.b32.xlu0 %v1171_v48, %s1709_s25 }
 0x101   :  { %1320 = vrot.lane.b32.xlu1 %v1318_v51, %s1711_s6 }
 0x102   :  { %1214 = vrot.lane.b32.xlu0 %v1212_v53, %s1710_s27 }
 0x105   :  { %1361 = vrot.lane.b32.xlu1 %v1359_v57, %s1712_s14  ;;  %v708_v57 = vstv %s1509_s30  ;;  %s2069_s30 = sld [smem:[#allocation3 + $0x36]] }
 0x106   :  { %1310 = vrot.lane.b32.xlu0 %v1308_v58, %s1711_s6  ;;  %v709_v61 = vmul.f32 %v708_v57, %v1877_v52 }
 0x109   :  { %1402 = vrot.lane.b32.xlu1 %v1400_v62, %s1713_s20 }
 0x10a   :  { %1351 = vrot.lane.b32.xlu0 %v1349_v63, %s1712_s14 }
 0x10d   :  { %273 = vrot.lane.b32.xlu1 %v271_v1, %s1694_s4 }
 0x10e   :  { %1392 = vrot.lane.b32.xlu0 %v1390_v4, %s1713_s20  ;;  %v764_v4 = vmul.f32 %v763_v60, %v1897_v2 }
 0x111   :  { %314 = vrot.lane.b32.xlu1 %v312_v8, %s1695_s7 }
 0x112   :  { %262 = vrot.lane.b32.xlu0 %v260_v9, %s1694_s4 }
 0x115   :  { %283 = vrot.lane.b32.xlu1 %v281_v16, %s1694_s4  ;;  %s1495_s4 = sld [smem:[#allocation3 + $0x5c]] }
 0x116   :  { %303 = vrot.lane.b32.xlu0 %v301_v17, %s1695_s7  ;;  %s1494_s7 = sld [smem:[#allocation3 + $0x2b]] }
 0x119   :  { %355 = vrot.lane.b32.xlu1 %v353_v20, %s1714_s15 }
 0x11a   :  { %344 = vrot.lane.b32.xlu0 %v342_v22, %s1714_s15  ;;  %s1514_s15 = sld [smem:[#allocation3 + $0x11]] }
 0x11b   :  { %v530_v40 = vstv %s1495_s4  ;;  %s1518_s4 = sld [smem:[#allocation3 + $0x1f]] }
 0x11c   :  { %v519_v41 = vstv %s1494_s7  ;;  %v531_v44 = vmul.f32 %v530_v40, %v1849_v34  ;;  %s1522_s7 = sld [smem:[#allocation3 + $0x2d]] }
 0x11d   :  { %410 = vrot.lane.b32.xlu1 %v408_v19, %s1696_s10  ;;  %v520_v28 = vmul.f32 %v519_v41, %v1860_v39  ;;  %v627_v39 = vmul.f32 %v626_v36, %v1877_v52 }
 0x11e   :  { %399 = vrot.lane.b32.xlu0 %v397_v26, %s1696_s10  ;;  %s1500_s10 = sld [smem:[#allocation3 + $0x10]] }
 0x121   :  { %451 = vrot.lane.b32.xlu1 %v449_v29, %s1697_s13  ;;  %v834_v17 = vstv %s1518_s4  ;;  %v941_v29 = vstv %s1525_s0  ;;  %s2180_s4 = sld [smem:[#allocation3 + $0x53]] }
 0x122   :  { %440 = vrot.lane.b32.xlu0 %v438_v31, %s1697_s13  ;;  %s1504_s13 = sld [smem:[#allocation3 + $0x1e]]  ;;  %v835_v22 = vmul.f32 %v834_v17, %v1904_v6  ;;  %v875_v15 = vstv %s1522_s7  ;;  %v930_v31 = vstv %s1524_s23  ;;  %v942_v32 = vmul.f32 %v941_v29, %v1917_v21  ;;  %s1721_s23 = smov 112  }
 0x123   :  { %v876_v25 = vmul.f32 %v875_v15, %v1904_v6  ;;  %s2195_s7 = sld [smem:[#allocation3 + $0x61]] }
 0x124   :  { %v615_v48 = vstv %s1500_s10  ;;  %s1717_s10 = smov 29   ;;  %s2199_s0 = sld [smem:[#allocation3 + $0x30]] }
 0x125   :  { %492 = vrot.lane.b32.xlu1 %v490_v33, %s1698_s16  ;;  %v616_v49 = vmul.f32 %v615_v48, %v1884_v55 }
 0x126   :  { %481 = vrot.lane.b32.xlu0 %v479_v37, %s1698_s16  ;;  %s1508_s16 = sld [smem:[#allocation3 + $0x2c]] }
 0x128   :  { %v656_v51 = vstv %s1504_s13  ;;  %s2060_s13 = sld [smem:[#allocation3 + $0x2e]] }
 0x129   :  { %533 = vrot.lane.b32.xlu1 %v531_v44, %s1715_s29  ;;  %v657_v56 = vmul.f32 %v656_v51, %v1884_v55 }
 0x12a   :  { %522 = vrot.lane.b32.xlu0 %v520_v28, %s1715_s29  ;;  %s2049_s29 = sld [smem:[#allocation3 + $0x38]] }
 0x12c   :  { %v697_v58 = vstv %s1508_s16  ;;  %s2072_s16 = sld [smem:[#allocation3 + $0x5]] }
 0x12d   :  { %588 = vrot.lane.b32.xlu1 %v586_v47, %s1699_s19  ;;  %v698_v63 = vmul.f32 %v697_v58, %v1884_v55  ;;  %v793_v55 = vstv %s1514_s15  ;;  %s2128_s15 = sld [smem:[#allocation3 + $0x2f]] }
 0x12e   :  { %577 = vrot.lane.b32.xlu0 %v575_v23, %s1699_s19  ;;  %s1515_s19 = sld [smem:[#allocation3 + $0x42]]  ;;  %v794_v14 = vmul.f32 %v793_v55, %v1904_v6  ;;  %v971_v6 = vstv %s1528_s1  ;;  %s1722_s1 = smov [#allocation10]  }
 0x12f   :  { %v2001_v34 = vpop.permute.xlu1 %293  ;;  %v972_v28 = vmul.f32 %v971_v6, %v1924_v10  ;;  %v1201_v6 = vstv %s2106_s8 }
 0x130   :  { %v295_v47 = vrot.slane %v2001_v34, 2  ;;  %v255_v48 = vstv %s2049_s29 }
 0x131   :  { %629 = vrot.lane.b32.xlu1 %v627_v39, %s1700_s22  ;;  %v256_v58 = vmul.f32 %v255_v48, %v1839_v30 }
 0x132   :  { %618 = vrot.lane.b32.xlu0 %v616_v49, %s1700_s22  ;;  %s1519_s22 = sld [smem:[#allocation3 + $0x50]]  ;;  %v1108_v55 = vstv %s2072_s16 }
 0x133   :  { %v2007_v53 = vpop.permute.xlu1 %334 }
 0x134   :  { %v804_v52 = vstv %s1515_s19  ;;  %v336_v39 = vrot.slane %v2007_v53, 2  ;;  %s2124_s19 = sld [smem:[#allocation3 + $0x60]] }
 0x135   :  { %670 = vrot.lane.b32.xlu1 %v668_v54, %s1701_s24  ;;  %v805_v9 = vmul.f32 %v804_v52, %v1897_v2  ;;  %v1053_v54 = vstv %s2060_s13 }
 0x136   :  { %659 = vrot.lane.b32.xlu0 %v657_v56, %s1701_s24  ;;  %s1523_s24 = sld [smem:[#allocation3 + $0x5e]]  ;;  %v296_v56 = vsel %vm265_vm13, %v2001_v34, %v295_v47  ;;  %v337_v60 = vsel %vm306_vm14, %v2007_v53, %v336_v39  ;;  %v1054_v34 = vmul.f32 %v1053_v54, %v1924_v10 }
 0x137   :  { %v2013_v59 = vpop.permute.xlu1 %430  ;;  %v298_v52 = vadd.f32 %v296_v56, %v256_v58  ;;  %v1231_v56 = vstv %s2128_s15 }
 0x138   :  { %v2016_v62 = vpop.permute.xlu0 %324  ;;  %v845_v16 = vstv %s1519_s22  ;;  %v432_v57 = vrot.slane %v2013_v59, 2  ;;  %s2144_s22 = sld [smem:[#allocation3 + $0x37]] }
 0x139   :  { %711 = vrot.lane.b32.xlu1 %v709_v61, %s1716_s18  ;;  %v846_v18 = vmul.f32 %v845_v16, %v1897_v2 }
 0x13a   :  { %700 = vrot.lane.b32.xlu0 %v698_v63, %s1716_s18  ;;  %s2162_s18 = sld [smem:[#allocation3 + $0x45]] }
 0x13b   :  { %v2019_v1 = vpop.permute.xlu1 %471 }
 0x13c   :  { %v2022_v5 = vpop.permute.xlu0 %420  ;;  %v886_v24 = vstv %s1523_s24  ;;  %v473_v0 = vrot.slane %v2019_v1, 2  ;;  %s2183_s24 = sld [smem:[#allocation3 + $0x22]] }
 0x13d   :  { %766 = vrot.lane.b32.xlu1 %v764_v4, %s1702_s2  ;;  %v887_v26 = vmul.f32 %v886_v24, %v1897_v2  ;;  %v931_v2 = vmul.f32 %v930_v31, %v1924_v10 }
 0x13e   :  { %755 = vrot.lane.b32.xlu0 %v753_v7, %s1702_s2  ;;  %s1529_s2 = sld [smem:[#allocation3 + $0x43]]  ;;  %v1119_v7 = vstv %s2069_s30  ;;  %v474_v16 = vsel %vm443_vm0, %v2019_v1, %v473_v0 }
 0x13f   :  { %v2027_v8 = vpop.permute.xlu1 %512 }
 0x140   :  { %v2030_v11 = vpop.permute.xlu0 %461  ;;  %v514_v53 = vrot.slane %v2027_v8, 2 }
 0x141   :  { %807 = vrot.lane.b32.xlu1 %v805_v9, %s1703_s28  ;;  %v339_v9 = vadd.f32 %v337_v60, %v298_v52  ;;  %v1232_v52 = vmul.f32 %v1231_v56, %v1945_v43  ;;  %v1409_v56 = vstv %s2199_s0 }
 0x142   :  { %796 = vrot.lane.b32.xlu0 %v794_v14, %s1703_s28  ;;  %s1533_s28 = sld [smem:[#allocation3 + $0x51]]  ;;  %v1120_v14 = vmul.f32 %v1119_v7, %v1937_v35  ;;  %v515_v1 = vsel %vm484_vm1, %v2027_v8, %v514_v53 }
 0x143   :  { %v2035_v3 = vpop.permute.xlu1 %608 }
 0x144   :  { %v2038_v20 = vpop.permute.xlu0 %502  ;;  %v982_v37 = vstv %s1529_s2  ;;  %v610_v17 = vrot.slane %v2035_v3, 2  ;;  %s242_s2 = sld [smem:[#allocation3]] }
 0x145   :  { %848 = vrot.lane.b32.xlu1 %v846_v18, %s1704_s5  ;;  %v983_v41 = vmul.f32 %v982_v37, %v1917_v21 }
 0x146   :  { %837 = vrot.lane.b32.xlu0 %v835_v22, %s1704_s5  ;;  %s2057_s5 = sld [smem:[#allocation3 + $0x5f]]  ;;  %v1109_v22 = vmul.f32 %v1108_v55, %v1945_v43 }
 0x147   :  { %v2043_v19 = vpop.permute.xlu1 %649 }
 0x148   :  { %v2046_v27 = vpop.permute.xlu0 %598  ;;  %v1023_v45 = vstv %s1533_s28  ;;  %s1458_s28 = sshll.u32 %s1722_s1, 4  ;;  %s1459_s28 = int_to_ptr.vmem [resolvable:$true] %s1458_s28 }
 0x149   :  { %889 = vrot.lane.b32.xlu1 %v887_v26, %s1717_s10  ;;  %v1024_v36 = vmul.f32 %v1023_v45, %v1917_v21  ;;  %v651_v26 = vrot.slane %v2043_v19, 2  ;;  %p1663_p11 = scmp.lt.s32.totalorder %s1459_s28, %s1459_s28 }
 0x14a   :  { %878 = vrot.lane.b32.xlu0 %v876_v25, %s1717_s10  ;;  %s1658_s10 = scalar_lea.vmem %s1459_s28, 64 }
 0x14b   :  { %v2051_v12 = vpop.permute.xlu1 %690  ;;  %p1659_p10 = scmp.ne.s32.totalorder %s1459_s28, %s1658_s10  ;;  %p1664_p12 = scmp.lt.s32.totalorder %s1658_s10, %s1658_s10 }
 0x14c   :  { %v2054_v33 = vpop.permute.xlu0 %639  ;;  %v1064_v51 = vstv %s2057_s5 }
 0x14d   :  { %944 = vrot.lane.b32.xlu1 %v942_v32, %s1705_s9  ;;  %v1065_v63 = vmul.f32 %v1064_v51, %v1917_v21  ;;  %v433_v21 = vsel %vm402_vm15, %v2013_v59, %v432_v57  ;;  %v611_v32 = vsel %vm580_vm2, %v2035_v3, %v610_v17  ;;  %v652_v3 = vsel %vm621_vm3, %v2043_v19, %v651_v26  ;;  %p1665_p13 = por %p1664_p12, %p1663_p11 }
 0x14e   :  { %933 = vrot.lane.b32.xlu0 %v931_v2, %s1705_s9  ;;  %s2085_s9 = sld [smem:[#allocation3 + $0x44]]  ;;  %v435_v24 = vadd.f32 %v433_v21, %v339_v9  ;;  %v692_v2 = vrot.slane %v2051_v12, 2  ;;  %v1242_v19 = vstv %s2124_s19 }
 0x14f   :  { %v2063_v40 = vpop.permute.xlu1 %786  ;;  %v1243_v60 = vmul.f32 %v1242_v19, %v1937_v35  ;;  %v1420_v19 = vstv %s2195_s7  ;;  %p1666_p0 = pnand %p1665_p13, %p1659_p10 }
 0x150   :  { %v2066_v44 = vpop.permute.xlu0 %680  ;;  %v476_v25 = vadd.f32 %v474_v16, %v435_v24  ;;  %v788_v45 = vrot.slane %v2063_v40, 2  ;;  %v693_v48 = vsel %vm662_vm4, %v2051_v12, %v692_v2 }
 0x151   :  { %985 = vrot.lane.b32.xlu1 %v983_v41, %s1706_s12 }
 0x152   :  { %974 = vrot.lane.b32.xlu0 %v972_v28, %s1706_s12  ;;  %s2089_s12 = sld [smem:[#allocation3 + $0x13]]  ;;  %v517_v41 = vadd.f32 %v515_v1, %v476_v25  ;;  %v1190_v28 = vstv %s2109_s11  ;;  %v789_v12 = vsel %vm758_vm5, %v2063_v40, %v788_v45  ;;  %v1297_v40 = vstv %s2144_s22 }
 0x153   :  { %v2076_v23 = vpop.permute.xlu1 %827  ;;  %v1191_v51 = vmul.f32 %v1190_v28, %v1945_v43  ;;  %v1298_v9 = vmul.f32 %v1297_v40, %v1842_v13 }
 0x154   :  { %v2081_v49 = vpop.permute.xlu0 %776  ;;  %v1160_v59 = vstv %s2085_s9  ;;  %v613_v46 = vadd.f32 %v611_v32, %v517_v41  ;;  %v829_v39 = vrot.slane %v2076_v23, 2 }
 0x155   :  { %1026 = vrot.lane.b32.xlu1 %v1024_v36, %s1707_s17  ;;  %v1161_v31 = vmul.f32 %v1160_v59, %v1937_v35  ;;  %v1202_v36 = vmul.f32 %v1201_v6, %v1937_v35  ;;  %v1338_v59 = vstv %s2162_s18  ;;  %v1379_v6 = vstv %s2180_s4 }
 0x156   :  { %1015 = vrot.lane.b32.xlu0 %v1013_v50, %s1707_s17  ;;  %s1718_s17 = smov 28   ;;  %v654_v54 = vadd.f32 %v652_v3, %v613_v46  ;;  %v830_v0 = vsel %vm2536_vm6, %v2076_v23, %v829_v39  ;;  %v1339_v25 = vmul.f32 %v1338_v59, %v1842_v13 }
 0x157   :  { %v2096_v61 = vpop.permute.xlu1 %868 }
 0x158   :  { %v2102_v4 = vpop.permute.xlu0 %817  ;;  %v1149_v15 = vstv %s2089_s12  ;;  %v870_v57 = vrot.slane %v2096_v61, 2  ;;  %v695_v58 = vadd.f32 %v693_v48, %v654_v54 }
 0x159   :  { %1067 = vrot.lane.b32.xlu1 %v1065_v63, %s1718_s17  ;;  %v1150_v8 = vmul.f32 %v1149_v15, %v1945_v43 }
 0x15a   :  { %1056 = vrot.lane.b32.xlu0 %v1054_v34, %s1718_s17  ;;  %v791_v55 = vadd.f32 %v789_v12, %v695_v58  ;;  %v871_v35 = vsel %vm2537_vm7, %v2096_v61, %v870_v57 }
 0x15b   :  { %v2114_v10 = vpop.permute.xlu1 %964 }
 0x15c   :  { %v2120_v18 = vpop.permute.xlu0 %858  ;;  %v966_v34 = vrot.slane %v2114_v10, 2  ;;  %v832_v53 = vadd.f32 %v830_v0, %v791_v55 }
 0x15d   :  { %1122 = vrot.lane.b32.xlu1 %v1120_v14, %s1708_s21 }
 0x15e   :  { %1111 = vrot.lane.b32.xlu0 %v1109_v22, %s1708_s21  ;;  %s2148_s21 = sld [smem:[#allocation3 + $0x6]]  ;;  %v967_v14 = vsel %vm2538_vm8, %v2114_v10, %v966_v34  ;;  %v873_v61 = vadd.f32 %v871_v35, %v832_v53  ;;  %v1410_v34 = vmul.f32 %v1409_v56, %v1864_v42 }
 0x15f   :  { %v2134_v29 = vpop.permute.xlu1 %1005 }
 0x160   :  { %v2140_v37 = vpop.permute.xlu0 %954  ;;  %v1007_v23 = vrot.slane %v2134_v29, 2  ;;  %v969_v1 = vadd.f32 %v967_v14, %v873_v61 }
 0x161   :  { %1163 = vrot.lane.b32.xlu1 %v1161_v31, %s1709_s25 }
 0x162   :  { %1152 = vrot.lane.b32.xlu0 %v1150_v8, %s1709_s25  ;;  %s2166_s25 = sld [smem:[#allocation3 + $0x14]]  ;;  %v1008_v10 = vsel %vm2533_vm9, %v2134_v29, %v1007_v23  ;;  %v1368_v29 = vstv %s2183_s24  ;;  %vm1292_vm9 = vcmask 998400  }
 0x163   :  { %v1047_v47 = vpop.permute.xlu1 %1046  ;;  %v1010_v41 = vadd.f32 %v1008_v10, %v969_v1  ;;  %v1369_v39 = vmul.f32 %v1368_v29, %v1864_v42  ;;  %v422_v29 = vrot.slane %v2022_v5, 2 }
 0x164   :  { %v2158_v50 = vpop.permute.xlu0 %995  ;;  %v1286_v21 = vstv %s2148_s21  ;;  %v1048_v16 = vrot.slane %v1047_v47, 2 }
 0x165   :  { %1204 = vrot.lane.b32.xlu1 %v1202_v36, %s1710_s27  ;;  %v1287_v22 = vmul.f32 %v1286_v21, %v1864_v42 }
 0x166   :  { %1193 = vrot.lane.b32.xlu0 %v1191_v51, %s1710_s27  ;;  %s1719_s27 = smov 27   ;;  %v1049_v31 = vsel %vm2532_vm10, %v1047_v47, %v1048_v16  ;;  %vm2535_vm10 = vcmask 482304   ;;  %v1380_v47 = vmul.f32 %v1379_v6, %v1842_v13 }
 0x167   :  { %v1143_v63 = vpop.permute.xlu1 %1142  ;;  %v1051_v45 = vadd.f32 %v1049_v31, %v1010_v41 }
 0x168   :  { %v2176_v7 = vpop.permute.xlu0 %1036  ;;  %v1327_v24 = vstv %s2166_s25  ;;  %v1144_v15 = vrot.slane %v1143_v63, 2 }
 0x169   :  { %1245 = vrot.lane.b32.xlu1 %v1243_v60, %s1719_s27  ;;  %v1328_v8 = vmul.f32 %v1327_v24, %v1864_v42 }
 0x16a   :  { %1234 = vrot.lane.b32.xlu0 %v1232_v52, %s1719_s27  ;;  %v1145_v28 = vsel %vm2534_vm11, %v1143_v63, %v1144_v15  ;;  %vm1333_vm11 = vcmask 736256   ;;  %v1421_v63 = vmul.f32 %v1420_v19, %v1842_v13  ;;  %v504_v19 = vrot.slane %v2038_v20, 2 }
 0x16b   :  { %v1184_v43 = vpop.permute.xlu1 %1183  ;;  %v1147_v54 = vadd.f32 %v1145_v28, %v1051_v45 }
 0x16c   :  { %v2191_v17 = vpop.permute.xlu0 %1132  ;;  %v1185_v32 = vrot.slane %v1184_v43, 2 }
 0x16d   :  { %1300 = vrot.lane.b32.xlu1 %v1298_v9, %s1711_s6 }
 0x16e   :  { %1289 = vrot.lane.b32.xlu0 %v1287_v22, %s1711_s6  ;;  %v1186_v36 = vsel %vm1155_vm12, %v1184_v43, %v1185_v32  ;;  %s1469_s6 = sld [smem:[#allocation3 + $0x31]] }
 0x16f   :  { %v1225_v26 = vpop.permute.xlu1 %1224  ;;  %v1188_v57 = vadd.f32 %v1186_v36, %v1147_v54 }
 0x170   :  { %v2206_v2 = vpop.permute.xlu0 %1173  ;;  %v1226_v3 = vrot.slane %v1225_v26, 2 }
 0x171   :  { %1341 = vrot.lane.b32.xlu1 %v1339_v25, %s1712_s14 }
 0x172   :  { %1330 = vrot.lane.b32.xlu0 %v1328_v8, %s1712_s14  ;;  %v1227_v12 = vsel %vm2535_vm10, %v1225_v26, %v1226_v3  ;;  %s1720_s14 = smov 26   ;;  %vm1374_vm10 = vcmask 474112   ;;  %v326_v8 = vrot.slane %v2016_v62, 2 }
 0x173   :  { %v1321_v46 = vpop.permute.xlu1 %1320  ;;  %v1229_v40 = vadd.f32 %v1227_v12, %v1188_v57  ;;  %v600_v12 = vrot.slane %v2046_v27, 2 }
 0x174   :  { %v2216_v48 = vpop.permute.xlu0 %1214  ;;  %v1322_v51 = vrot.slane %v1321_v46, 2  ;;  %v247_v9 = vstv %s1469_s6 }
 0x175   :  { %1382 = vrot.lane.b32.xlu1 %v1380_v47, %s1713_s20  ;;  %v248_v59 = vmul.f32 %v247_v9, %v1839_v30  ;;  %v463_v47 = vrot.slane %v2030_v11, 2  ;;  %v860_v9 = vrot.slane %v2120_v18, 2 }
 0x176   :  { %1371 = vrot.lane.b32.xlu0 %v1369_v39, %s1713_s20  ;;  %v1323_v60 = vsel %vm1292_vm9, %v1321_v46, %v1322_v51  ;;  %s1470_s20 = sld [smem:[#allocation3 + $0x7]]  ;;  %v327_v46 = vsel %vm306_vm14, %v2016_v62, %v326_v8  ;;  %v423_v51 = vsel %vm402_vm15, %v2022_v5, %v422_v29  ;;  %v505_v62 = vsel %vm484_vm1, %v2038_v20, %v504_v19 }
 0x177   :  { %v1362_v58 = vpop.permute.xlu1 %1361  ;;  %v1325_v21 = vadd.f32 %v1323_v60, %v1229_v40  ;;  %v464_v56 = vsel %vm443_vm0, %v2030_v11, %v463_v47  ;;  %v601_v5 = vsel %vm580_vm2, %v2046_v27, %v600_v12 }
 0x178   :  { %v2226_v0 = vpop.permute.xlu0 %1310  ;;  %v1363_v52 = vrot.slane %v1362_v58, 2 }
 0x179   :  { %1423 = vrot.lane.b32.xlu1 %v1421_v63, %s1720_s14  ;;  %v641_v63 = vrot.slane %v2054_v33, 2 }
 0x17a   :  { %1412 = vrot.lane.b32.xlu0 %v1410_v34, %s1720_s14  ;;  %v1364_v55 = vsel %vm1333_vm11, %v1362_v58, %v1363_v52  ;;  %v682_v52 = vrot.slane %v2066_v44, 2 }
 0x17b   :  { %v1403_v35 = vpop.permute.xlu1 %1402  ;;  %v1366_v13 = vadd.f32 %v1364_v55, %v1325_v21  ;;  %v642_v11 = vsel %vm621_vm3, %v2054_v33, %v641_v63  ;;  %v778_v55 = vrot.slane %v2081_v49, 2 }
 0x17c   :  { %v2230_v23 = vpop.permute.xlu0 %1351  ;;  %v1404_v53 = vrot.slane %v1403_v35, 2  ;;  %v251_v25 = vstv %s1470_s20  ;;  %v683_v20 = vsel %vm662_vm4, %v2066_v44, %v682_v52  ;;  %v861_v44 = vsel %vm2537_vm7, %v2120_v18, %v860_v9 }
 0x17d   :  { %v252_v41 = vmul.f32 %v251_v25, %v1856_v38  ;;  %v779_v27 = vsel %vm758_vm5, %v2081_v49, %v778_v55  ;;  %v1134_v25 = vrot.slane %v2191_v17, 2  ;;  %vm2540_vm7 = vcmask 490496  }
 0x17e   :  { %v1405_v43 = vsel %vm1374_vm10, %v1403_v35, %v1404_v53  ;;  %v819_v53 = vrot.slane %v2102_v4, 2 }
 0x17f   :  { %v1407_v14 = vadd.f32 %v1405_v43, %v1366_v13  ;;  %v274_v42 = vpop.permute.xlu1 %273 }
 0x180   :  { %v2233_v16 = vpop.permute.xlu0 %1392  ;;  %v275_v22 = vrot.slane %v274_v42, 2  ;;  %v820_v33 = vsel %vm2536_vm6, %v2102_v4, %v819_v53  ;;  %vm2539_vm6 = vcmask 752640  }
 0x181   :  { %1438 = vrot.lane.b32.xlu1 %v1407_v14, %s1721_s23 }
 0x182   :  { %v276_v61 = vsel %vm265_vm13, %v274_v42, %v275_v22  ;;  %v956_v42 = vrot.slane %v2140_v37, 2 }
 0x183   :  { %v278_v24 = vadd.f32 %v276_v61, %v248_v59  ;;  %v315_v10 = vpop.permute.xlu1 %314  ;;  %v997_v61 = vrot.slane %v2158_v50, 2 }
 0x184   :  { %v2238_v15 = vpop.permute.xlu0 %262  ;;  %v316_v1 = vrot.slane %v315_v10, 2  ;;  %v957_v49 = vsel %vm2538_vm8, %v2140_v37, %v956_v42  ;;  %vm2541_vm8 = vcmask 1006592  }
 0x185   :  { %v998_v4 = vsel %vm2539_vm6, %v2158_v50, %v997_v61  ;;  %v1135_v37 = vsel %vm2541_vm8, %v2191_v17, %v1134_v25  ;;  %vm2542_vm6 = vcmask 482304   ;;  %v264_v61 = vrot.slane %v2238_v15, 2 }
 0x186   :  { %v317_v26 = vsel %vm306_vm14, %v315_v10, %v316_v1  ;;  %v1038_v1 = vrot.slane %v2176_v7, 2  ;;  %vm2549_vm8 = vcmask 752640  }
 0x187   :  { %v2241_v31 = vadd.f32 %v317_v26, %v278_v24  ;;  %v284_v32 = vpop.permute.xlu1 %283 }
 0x188   :  { %v2244_v6 = vpop.permute.xlu0 %303  ;;  %v285_v30 = vrot.slane %v284_v32, 2  ;;  %v1039_v18 = vsel %vm2540_vm7, %v2176_v7, %v1038_v1  ;;  %vm347_vm7 = vcmask 261120  }
 0x189   :  { %v305_v1 = vrot.slane %v2244_v6, 2 }
 0x18a   :  { %v286_v28 = vsel %vm265_vm13, %v284_v32, %v285_v30  ;;  %v1175_v30 = vrot.slane %v2206_v2, 2 }
 0x18b   :  { %v288_v3 = vadd.f32 %v286_v28, %v252_v41  ;;  %v2249_v45 = vpop.permute.xlu1 %355  ;;  %v1216_v28 = vrot.slane %v2216_v48, 2 }
 0x18c   :  { %v2254_v39 = vpop.permute.xlu0 %344  ;;  %v1176_v50 = vsel %vm1155_vm12, %v2206_v2, %v1175_v30  ;;  %v357_v25 = vrot.slane %v2249_v45, 2  ;;  %v307_v30 = vsel %vm306_vm14, %v2244_v6, %v305_v1  ;;  %vm703_vm14 = vcmask 244736  }
 0x18d   :  { %v329_v36 = vadd.f32 %v327_v46, %v288_v3  ;;  %v1312_v46 = vrot.slane %v2226_v0, 2  ;;  %v1217_v7 = vsel %vm2542_vm6, %v2216_v48, %v1216_v28  ;;  %vm2550_vm6 = vmmov %vm2549_vm8 }
 0x18f   :  { %v425_v54 = vadd.f32 %v423_v51, %v329_v36  ;;  %v2262_v58 = vpop.permute.xlu1 %410  ;;  %v1353_v51 = vrot.slane %v2230_v23, 2  ;;  %v1313_v17 = vsel %vm1292_vm9, %v2226_v0, %v1312_v46 }
 0x190   :  { %v2267_v34 = vpop.permute.xlu0 %399 }
 0x191   :  { %v466_v57 = vadd.f32 %v464_v56, %v425_v54  ;;  %v1394_v56 = vrot.slane %v2233_v16, 2  ;;  %v1354_v2 = vsel %vm1333_vm11, %v2230_v23, %v1353_v51 }
 0x193   :  { %v507_v60 = vadd.f32 %v505_v62, %v466_v57  ;;  %v2275_v35 = vpop.permute.xlu1 %451  ;;  %v1395_v48 = vsel %vm1374_vm10, %v2233_v16, %v1394_v56 }
 0x194   :  { %v2280_v43 = vpop.permute.xlu0 %440 }
 0x195   :  { %v603_v40 = vadd.f32 %v601_v5, %v507_v60  ;;  %v442_v46 = vrot.slane %v2280_v43, 2 }
 0x197   :  { %v644_v21 = vadd.f32 %v642_v11, %v603_v40  ;;  %v2288_v59 = vpop.permute.xlu1 %492 }
 0x198   :  { %v2293_v24 = vpop.permute.xlu0 %481 }
 0x199   :  { %v685_v13 = vadd.f32 %v683_v20, %v644_v21  ;;  %v483_v51 = vrot.slane %v2293_v24, 2 }
 0x19b   :  { %v781_v14 = vadd.f32 %v779_v27, %v685_v13  ;;  %v2301_v32 = vpop.permute.xlu1 %533 }
 0x19c   :  { %v2306_v41 = vpop.permute.xlu0 %522 }
 0x19d   :  { %v822_v22 = vadd.f32 %v820_v33, %v781_v14 }
 0x19f   :  { %v863_v10 = vadd.f32 %v861_v44, %v822_v22  ;;  %v2314_v47 = vpop.permute.xlu1 %588 }
 0x1a0   :  { %v2319_v19 = vpop.permute.xlu0 %577 }
 0x1a1   :  { %v959_v26 = vadd.f32 %v957_v49, %v863_v10  ;;  %v243_v49 = vstv %s242_s2 }
 0x1a3   :  { %v1000_v8 = vadd.f32 %v998_v4, %v959_v26  ;;  %v2326_v57 = vpop.permute.xlu1 %629  ;;  %v266_v26 = vsel %vm265_vm13, %v2238_v15, %v264_v61  ;;  %v346_v4 = vrot.slane %v2254_v39, 2  ;;  %vm525_vm13 = vcmask 252928  }
 0x1a4   :  { %v2330_v63 = vpop.permute.xlu0 %618  ;;  %v590_v61 = vrot.slane %v2314_v47, 2 }
 0x1a5   :  { %v1041_v29 = vadd.f32 %v1039_v18, %v1000_v8  ;;  %v244_v8 = vmul.f32 %v243_v49, %v1856_v38  ;;  %v348_v15 = vsel %vm347_vm7, %v2254_v39, %v346_v4  ;;  %v453_v38 = vrot.slane %v2275_v35, 2 }
 0x1a6   :  { %v620_v4 = vrot.slane %v2330_v63, 2 }
 0x1a7   :  { %v1137_v3 = vadd.f32 %v1135_v37, %v1041_v29  ;;  %v2333_v5 = vpop.permute.xlu1 %670  ;;  %v401_v29 = vrot.slane %v2267_v34, 2  ;;  %v412_v37 = vrot.slane %v2262_v58, 2  ;;  %v268_v28 = vadd.f32 %v266_v26, %v244_v8 }
 0x1a8   :  { %v2335_v0 = vpop.permute.xlu0 %659 }
 0x1a9   :  { %v1178_v36 = vadd.f32 %v1176_v50, %v1137_v3  ;;  %v358_v50 = vsel %vm347_vm7, %v2249_v45, %v357_v25  ;;  %v413_v6 = vsel %vm402_vm15, %v2262_v58, %v412_v37  ;;  %v444_v45 = vsel %vm443_vm0, %v2280_v43, %v442_v46 }
 0x1aa   :  { %v360_v39 = vadd.f32 %v358_v50, %v2241_v31  ;;  %v485_v31 = vsel %vm484_vm1, %v2293_v24, %v483_v51  ;;  %v579_v43 = vrot.slane %v2319_v19, 2  ;;  %v631_v25 = vrot.slane %v2326_v57, 2 }
 0x1ab   :  { %v1219_v54 = vadd.f32 %v1217_v7, %v1178_v36  ;;  %v2337_v52 = vpop.permute.xlu1 %711  ;;  %v309_v36 = vadd.f32 %v307_v30, %v268_v28  ;;  %v403_v7 = vsel %vm402_vm15, %v2267_v34, %v401_v29  ;;  %v524_v34 = vrot.slane %v2306_v41, 2 }
 0x1ac   :  { %v2339_v40 = vpop.permute.xlu0 %700  ;;  %v591_v29 = vsel %vm580_vm2, %v2314_v47, %v590_v61  ;;  %v661_v37 = vrot.slane %v2335_v0, 2  ;;  %v622_v50 = vsel %vm621_vm3, %v2330_v63, %v620_v4  ;;  %v632_v46 = vsel %vm621_vm3, %v2326_v57, %v631_v25 }
 0x1ad   :  { %v1315_v12 = vadd.f32 %v1313_v17, %v1219_v54  ;;  %v494_v54 = vrot.slane %v2288_v59, 2  ;;  %v350_v17 = vadd.f32 %v348_v15, %v309_v36  ;;  %v526_v1 = vsel %vm525_vm13, %v2306_v41, %v524_v34 }
 0x1ae   :  { %v672_v41 = vrot.slane %v2333_v5, 2  ;;  %vm2543_vm15 = vcmask 760832   ;;  %vm1059_vm7 = vcmask 228352  }
 0x1af   :  { %v1356_v62 = vadd.f32 %v1354_v2, %v1315_v12  ;;  %v2341_v23 = vpop.permute.xlu1 %766  ;;  %v454_v12 = vsel %vm443_vm0, %v2275_v35, %v453_v38  ;;  %v535_v2 = vrot.slane %v2301_v32, 2  ;;  %v405_v58 = vadd.f32 %v403_v7, %v350_v17  ;;  %vm2544_vm0 = vmmov %vm2543_vm15 }
 0x1b0   :  { %v2343_v11 = vpop.permute.xlu0 %755  ;;  %v702_v38 = vrot.slane %v2339_v40, 2  ;;  %v663_v7 = vsel %vm662_vm4, %v2335_v0, %v661_v37  ;;  %v768_v63 = vrot.slane %v2341_v23, 2 }
 0x1b1   :  { %v1397_v60 = vadd.f32 %v1395_v48, %v1356_v62  ;;  %v415_v62 = vadd.f32 %v413_v6, %v360_v39  ;;  %v446_v35 = vadd.f32 %v444_v45, %v405_v58  ;;  %v536_v26 = vsel %vm525_vm13, %v2301_v32, %v535_v2 }
 0x1b2   :  { %v673_v6 = vsel %vm662_vm4, %v2333_v5, %v672_v41  ;;  %v757_v51 = vrot.slane %v2343_v11, 2  ;;  %v704_v39 = vsel %vm703_vm14, %v2339_v40, %v702_v38  ;;  %vm2547_vm4 = vcmask 1014784  }
 0x1b3   :  { %1430 = vrot.lane.b32.xlu0 %v1397_v60, %s1721_s23  ;;  %v2345_v55 = vpop.permute.xlu1 %807  ;;  %v495_v60 = vsel %vm484_vm1, %v2288_v59, %v494_v54  ;;  %v456_v49 = vadd.f32 %v454_v12, %v415_v62  ;;  %v487_v8 = vadd.f32 %v485_v31, %v446_v35  ;;  %v581_v59 = vsel %vm580_vm2, %v2319_v19, %v579_v43 }
 0x1b4   :  { %v2347_v16 = vpop.permute.xlu0 %796  ;;  %v713_v19 = vrot.slane %v2337_v52, 2  ;;  %v809_v34 = vrot.slane %v2345_v55, 2  ;;  %v759_v5 = vsel %vm758_vm5, %v2343_v11, %v757_v51  ;;  %v769_v62 = vsel %vm758_vm5, %v2341_v23, %v768_v63  ;;  %vm2548_vm5 = vmmov %vm2547_vm4 }
 0x1b5   :  { %v497_v30 = vadd.f32 %v495_v60, %v456_v49  ;;  %v528_v28 = vadd.f32 %v526_v1, %v487_v8  ;;  %v798_v12 = vrot.slane %v2347_v16, 2  ;;  %vm881_vm1 = vcmask 236544  }
 0x1b6   :  { %v714_v45 = vsel %vm703_vm14, %v2337_v52, %v713_v19  ;;  %v810_v61 = vsel %vm2544_vm0, %v2345_v55, %v809_v34  ;;  %vm2545_vm2 = vcmask 498688   ;;  %vm2551_vm13 = vcmask 490496  }
 0x1b7   :  { %v2349_v21 = vpop.permute.xlu1 %848  ;;  %v538_v32 = vadd.f32 %v536_v26, %v497_v30  ;;  %v583_v36 = vadd.f32 %v581_v59, %v528_v28  ;;  %v800_v43 = vsel %vm2543_vm15, %v2347_v16, %v798_v12  ;;  %vm2546_vm3 = vmmov %vm2545_vm2  ;;  %vm2553_vm15 = vcmask 1006592  }
 0x1b8   :  { %v2351_v20 = vpop.permute.xlu0 %837  ;;  %v850_v40 = vrot.slane %v2349_v21, 2  ;;  %vm2552_vm14 = vmmov %vm2551_vm13 }
 0x1b9   :  { %v593_v47 = vadd.f32 %v591_v29, %v538_v32  ;;  %v624_v54 = vadd.f32 %v622_v50, %v583_v36  ;;  %v839_v31 = vrot.slane %v2351_v20, 2  ;;  %vm2554_vm0 = vmmov %vm2553_vm15 }
 0x1ba   :  { %v851_v4 = vsel %vm2546_vm3, %v2349_v21, %v850_v40 }
 0x1bb   :  { %v2353_v53 = vpop.permute.xlu1 %889  ;;  %v634_v17 = vadd.f32 %v632_v46, %v593_v47  ;;  %v665_v0 = vadd.f32 %v663_v7, %v624_v54  ;;  %v841_v26 = vsel %vm2545_vm2, %v2351_v20, %v839_v31  ;;  %vm2555_vm2 = vcmask 482304  }
 0x1bc   :  { %v2355_v13 = vpop.permute.xlu0 %878  ;;  %v891_v49 = vrot.slane %v2353_v53, 2  ;;  %vm2556_vm3 = vmmov %vm2555_vm2 }
 0x1bd   :  { %v675_v2 = vadd.f32 %v673_v6, %v634_v17  ;;  %v706_v60 = vadd.f32 %v704_v39, %v665_v0  ;;  %v880_v35 = vrot.slane %v2355_v13, 2 }
 0x1be   :  { %v892_v29 = vsel %vm881_vm1, %v2353_v53, %v891_v49 }
 0x1bf   :  { %v2357_v27 = vpop.permute.xlu1 %944  ;;  %v716_v52 = vadd.f32 %v714_v45, %v675_v2  ;;  %v761_v11 = vadd.f32 %v759_v5, %v706_v60  ;;  %v882_v59 = vsel %vm881_vm1, %v2355_v13, %v880_v35  ;;  %vm1237_vm1 = vcmask 220160  }
 0x1c0   :  { %v2359_v9 = vpop.permute.xlu0 %933  ;;  %v946_v25 = vrot.slane %v2357_v27, 2 }
 0x1c1   :  { %v771_v1 = vadd.f32 %v769_v62, %v716_v52  ;;  %v935_v16 = vrot.slane %v2359_v9, 2  ;;  %v802_v55 = vadd.f32 %v800_v43, %v761_v11 }
 0x1c2   :  { %v947_v32 = vsel %vm2548_vm5, %v2357_v27, %v946_v25 }
 0x1c3   :  { %v2361_v14 = vpop.permute.xlu1 %985  ;;  %v812_v8 = vadd.f32 %v810_v61, %v771_v1  ;;  %v843_v20 = vadd.f32 %v841_v26, %v802_v55  ;;  %v937_v21 = vsel %vm2547_vm4, %v2359_v9, %v935_v16 }
 0x1c4   :  { %v2363_v33 = vpop.permute.xlu0 %974  ;;  %v987_v41 = vrot.slane %v2361_v14, 2 }
 0x1c5   :  { %v976_v37 = vrot.slane %v2363_v33, 2  ;;  %v853_v28 = vadd.f32 %v851_v4, %v812_v8  ;;  %v884_v38 = vadd.f32 %v882_v59, %v843_v20 }
 0x1c6   :  { %v988_v36 = vsel %vm2550_vm6, %v2361_v14, %v987_v41 }
 0x1c7   :  { %v2365_v42 = vpop.permute.xlu1 %1026  ;;  %v894_v13 = vadd.f32 %v892_v29, %v853_v28  ;;  %v978_v53 = vsel %vm2549_vm8, %v2363_v33, %v976_v37  ;;  %v939_v7 = vadd.f32 %v937_v21, %v884_v38 }
 0x1c8   :  { %v2367_v22 = vpop.permute.xlu0 %1015  ;;  %v1028_v46 = vrot.slane %v2365_v42, 2 }
 0x1c9   :  { %v1017_v50 = vrot.slane %v2367_v22, 2  ;;  %v949_v6 = vadd.f32 %v947_v32, %v894_v13  ;;  %v980_v17 = vadd.f32 %v978_v53, %v939_v7 }
 0x1ca   :  { %v1029_v63 = vsel %vm2552_vm14, %v2365_v42, %v1028_v46 }
 0x1cb   :  { %v2369_v44 = vpop.permute.xlu1 %1067  ;;  %v1019_v51 = vsel %vm2551_vm13, %v2367_v22, %v1017_v50  ;;  %v990_v14 = vadd.f32 %v988_v36, %v949_v6 }
 0x1cc   :  { %v2372_v10 = vpop.permute.xlu0 %1056  ;;  %v1069_v9 = vrot.slane %v2369_v44, 2  ;;  %v1021_v0 = vadd.f32 %v1019_v51, %v980_v17 }
 0x1cd   :  { %v1058_v47 = vrot.slane %v2372_v10, 2  ;;  %v1031_v2 = vadd.f32 %v1029_v63, %v990_v14 }
 0x1ce   :  { %v1070_v45 = vsel %vm1059_vm7, %v2369_v44, %v1069_v9 }
 0x1cf   :  { %v2380_v18 = vpop.permute.xlu1 %1122  ;;  %v1060_v39 = vsel %vm1059_vm7, %v2372_v10, %v1058_v47  ;;  %v1072_v40 = vadd.f32 %v1070_v45, %v1031_v2 }
 0x1d0   :  { %v2386_v3 = vpop.permute.xlu0 %1111  ;;  %v1124_v33 = vrot.slane %v2380_v18, 2  ;;  %v1062_v10 = vadd.f32 %v1060_v39, %v1021_v0 }
 0x1d1   :  { %v1113_v54 = vrot.slane %v2386_v3, 2 }
 0x1d2   :  { %v1125_v5 = vsel %vm2554_vm0, %v2380_v18, %v1124_v33 }
 0x1d3   :  { %v2399_v56 = vpop.permute.xlu1 %1163  ;;  %v1115_v42 = vsel %vm2553_vm15, %v2386_v3, %v1113_v54  ;;  %v1127_v35 = vadd.f32 %v1125_v5, %v1072_v40 }
 0x1d4   :  { %v2407_v48 = vpop.permute.xlu0 %1152  ;;  %v1165_v34 = vrot.slane %v2399_v56, 2  ;;  %v1117_v61 = vadd.f32 %v1115_v42, %v1062_v10 }
 0x1d5   :  { %v1154_v12 = vrot.slane %v2407_v48, 2 }
 0x1d6   :  { %v1166_v52 = vsel %vm1155_vm12, %v2399_v56, %v1165_v34 }
 0x1d7   :  { %v2419_v24 = vpop.permute.xlu1 %1204  ;;  %v1156_v60 = vsel %vm1155_vm12, %v2407_v48, %v1154_v12  ;;  %v1168_v26 = vadd.f32 %v1166_v52, %v1127_v35  ;;  %vm1415_vm12 = vcmask 211968  }
 0x1d8   :  { %v2427_v15 = vpop.permute.xlu0 %1193  ;;  %v1206_v31 = vrot.slane %v2419_v24, 2  ;;  %v1158_v1 = vadd.f32 %v1156_v60, %v1117_v61 }
 0x1d9   :  { %v1195_v62 = vrot.slane %v2427_v15, 2 }
 0x1da   :  { %v1207_v49 = vsel %vm2556_vm3, %v2419_v24, %v1206_v31 }
 0x1db   :  { %v2441_v57 = vpop.permute.xlu1 %1245  ;;  %v1197_v18 = vsel %vm2555_vm2, %v2427_v15, %v1195_v62  ;;  %v1209_v59 = vadd.f32 %v1207_v49, %v1168_v26 }
 0x1dc   :  { %v2447_v58 = vpop.permute.xlu0 %1234  ;;  %v1247_v3 = vrot.slane %v2441_v57, 2  ;;  %v1199_v8 = vadd.f32 %v1197_v18, %v1158_v1 }
 0x1dd   :  { %v1236_v43 = vrot.slane %v2447_v58, 2 }
 0x1de   :  { %v1248_v16 = vsel %vm1237_vm1, %v2441_v57, %v1247_v3 }
 0x1df   :  { %v2461_v23 = vpop.permute.xlu1 %1300  ;;  %v1238_v4 = vsel %vm1237_vm1, %v2447_v58, %v1236_v43  ;;  %v1250_v28 = vadd.f32 %v1248_v16, %v1209_v59 }
 0x1e0   :  { %v2469_v30 = vpop.permute.xlu0 %1289  ;;  %v1302_v48 = vrot.slane %v2461_v23, 2  ;;  %v1240_v20 = vadd.f32 %v1238_v4, %v1199_v8 }
 0x1e1   :  { %v1291_v11 = vrot.slane %v2469_v30, 2 }
 0x1e2   :  { %v1303_v24 = vsel %vm1292_vm9, %v2461_v23, %v1302_v48 }
 0x1e3   :  { %v1342_v19 = vpop.permute.xlu1 %1341  ;;  %v1293_v15 = vsel %vm1292_vm9, %v2469_v30, %v1291_v11  ;;  %v1305_v38 = vadd.f32 %v1303_v24, %v1250_v28  ;;  %vm1433_vm9 = vcmask 916480  }
 0x1e4   :  { %v1331_v27 = vpop.permute.xlu0 %1330  ;;  %v1343_v55 = vrot.slane %v1342_v19, 2  ;;  %v1295_v46 = vadd.f32 %v1293_v15, %v1240_v20 }
 0x1e5   :  { %v1332_v25 = vrot.slane %v1331_v27, 2 }
 0x1e6   :  { %v1344_v57 = vsel %vm1333_vm11, %v1342_v19, %v1343_v55 }
 0x1e7   :  { %v1383_v22 = vpop.permute.xlu1 %1382  ;;  %v1334_v58 = vsel %vm1333_vm11, %v1331_v27, %v1332_v25  ;;  %v1346_v36 = vadd.f32 %v1344_v57, %v1305_v38 }
 0x1e8   :  { %v1372_v44 = vpop.permute.xlu0 %1371  ;;  %v1384_v41 = vrot.slane %v1383_v22, 2  ;;  %v1336_v23 = vadd.f32 %v1334_v58, %v1295_v46 }
 0x1e9   :  { %v1373_v37 = vrot.slane %v1372_v44, 2 }
 0x1ea   :  { %v1385_v30 = vsel %vm1374_vm10, %v1383_v22, %v1384_v41 }
 0x1eb   :  { %v1424_v56 = vpop.permute.xlu1 %1423  ;;  %v1375_v13 = vsel %vm1374_vm10, %v1372_v44, %v1373_v37  ;;  %v1387_v6 = vadd.f32 %v1385_v30, %v1346_v36 }
 0x1ec   :  { %v1413_v29 = vpop.permute.xlu0 %1412  ;;  %v1425_v50 = vrot.slane %v1424_v56, 2  ;;  %v1377_v7 = vadd.f32 %v1375_v13, %v1336_v23 }
 0x1ed   :  { %v1414_v32 = vrot.slane %v1413_v29, 2 }
 0x1ee   :  { %v1426_v9 = vsel %vm1415_vm12, %v1424_v56, %v1425_v50 }
 0x1ef   :  { %v1416_v47 = vsel %vm1415_vm12, %v1413_v29, %v1414_v32  ;;  %v1428_v54 = vadd.f32 %v1426_v9, %v1387_v6 }
 0x1f0   :  { %v1418_v63 = vadd.f32 %v1416_v47, %v1377_v7 }
 0x1f3   :  { %v1439_v21 = vpop.permute.xlu1 %1438 }
 0x1f4   :  { %v1440_v53 = vrot.slane %v1439_v21, 2 }
 0x1f6   :  { %v1441_v51 = vsel %vm1433_vm9, %v1439_v21, %v1440_v53 }
 0x1f7   :  { %v1443_v17 = vadd.f32 %v1441_v51, %v1428_v54 }
 0x225   :  { %v1431_v27 = vpop.permute.xlu0 %1430 }
 0x226   :  { %v1432_v19 = vrot.slane %v1431_v27, 2 }
 0x228   :  { %v1434_v33 = vsel %vm1433_vm9, %v1431_v27, %v1432_v19 }
 0x229   :  { %v1436_v14 = vadd.f32 %v1434_v33, %v1418_v63 }
 0x22b   :  { %v1444_v39 = vadd.f32 %v1443_v17, %v1436_v14 }
 0x22d   :  { %v1566_v45 = vmul.f32 -1.442695, %v1444_v39 }
 0x22f   :  { %1606 = vpow2.f32 %v1566_v45 }
 0x23c   :  { %v1607_v12 = vpop.eup %1606 }
 0x23d   :  { %v1448_v34 = vadd.f32 1.0, %v1607_v12 }
 0x23f   :  { %1608 = vrcp.f32 %v1448_v34 }
 0x24c   :  { %v1609_v0 = vpop.eup %1608 }
 0x24d   :  { %1451 = vst [vmem:[#allocation10] sm:$0xf] %v1609_v0 }
 0x24e   :  { %1669 = shalt.err (!%p1666_p0)
}
 0x24f   :  { %1461 = dma.vmem_to_hbm [thread:$0]  %s1459_s28, 64, %s2531_s3, [#allocation5]  }
 0x250   :  { %1684 = dma.done.wait [#allocation5], 64  }
 0x251   :  { %1685 = vsyncadd [#allocation5], 4294967232 }
 0x252   :  { %1465 = vsyncpa [#allocation4], 1 }
 0x253   :  { %1466 = vsyncpa [#allocation9], 1 }
 0x254   :  { %1467 = vsyncpa [#allocation5], 1 }
 0x255   :  { %1468 = vsyncpa [#allocation6], 1 }

</bundles_post_ra>
